<compile_context>
chip_gen: v6e
topology: v6e:2x2x1
jax: 0.10.0
libtpu: 0.0.40
codegen_flags: <defaults>
</compile_context>

<pallas_src>
import functools

import jax
import jax.numpy as jnp
from jax.experimental import pallas as pl
from jax.experimental.pallas import tpu as pltpu  # noqa: F401

LN_EPS = 1e-5  # PyTorch nn.LayerNorm default


def _layernorm(v, gamma, beta):
    mu = jnp.mean(v, axis=-1, keepdims=True)
    var = jnp.mean((v - mu) ** 2, axis=-1, keepdims=True)  # biased var (PyTorch)
    return (v - mu) * jax.lax.rsqrt(var + LN_EPS) * gamma + beta


def _bmm(a, b):
    """(G, M, K) x (G, K, N) -> (G, M, N), f32 accumulation on the MXU."""
    return jax.lax.dot_general(a, b, (((2,), (1,)), ((0,), (0,))),
                               preferred_element_type=jnp.float32)


def _bmm_nt(a, b):
    """(G, M, K) x (G, N, K) -> (G, M, N) (contract the last dim of both)."""
    return jax.lax.dot_general(a, b, (((2,), (2,)), ((0,), (0,))),
                               preferred_element_type=jnp.float32)


def decoder_layer_kernel(
    x_ref, hs_ref,
    wqkv1_ref, wo1_ref,
    wq2_ref, wkv2_ref, wo2_ref,
    wf1_ref, wf2_ref,
    vecs_ref,
    y_ref,
    *, B, Lt, Ls, H, Dk, D, Dff,
):
    """Whole decoder layer in one invocation (no grid).

    x_ref:  (B*Lt, D) flattened target-side activations.
    hs_ref: (B*Ls, D) flattened encoder-side activations.
    vecs_ref: (10, max(D, Dff)) packed small vectors, rows:
        0 bo1, 1 g1, 2 be1, 3 bo2, 4 g2, 5 be2, 6 bf1, 7 bf2, 8 g3, 9 be3.
    """
    x = x_ref[...]
    hs = hs_ref[...]
    vecs = vecs_ref[...]

    def vrow(r, width):
        return vecs[r:r + 1, :width]          # (1, width), broadcasts over rows

    bo1, g1, be1 = vrow(0, D), vrow(1, D), vrow(2, D)
    bo2, g2, be2 = vrow(3, D), vrow(4, D), vrow(5, D)
    bf1 = vrow(6, Dff)
    bf2, g3, be3 = vrow(7, D), vrow(8, D), vrow(9, D)

    def heads(flat, w):
        """Head-batched projection: (B*L, D) x (H, D, C) -> (H, B*L, C).

        The head axis comes straight out of the batched matmul (leading-dim
        broadcast of the activations), so no lane->major transposes are needed.
        """
        xb = jnp.broadcast_to(flat[None], (H,) + flat.shape)
        return _bmm(xb, w)

    def attention_core(q, k, v, Lq, Lk, wo, bo):
        """q: (H, B*Lq, Dk); k, v: (H, B*Lk, Dk); wo: (H, Dk, D) -> (B*Lq, D)."""
        # Regroup to one (head, batch) tile per leading index; these reshapes
        # only split/merge dims at the 8-row sublane-tile boundary.
        qg = q.reshape(H * B, Lq, Dk)
        kg = k.reshape(H * B, Lk, Dk)
        vg = v.reshape(H * B, Lk, Dk)
        s = _bmm_nt(qg, kg)                                   # (H*B, Lq, Lk)
        m = jnp.max(s, axis=-1, keepdims=True)
        e = jnp.exp(s - m)
        p = e * pl.reciprocal(jnp.sum(e, axis=-1, keepdims=True), approx=True)
        ctx = _bmm(p, vg)                                     # (H*B, Lq, Dk)
        ctx = ctx.reshape(H, B * Lq, Dk)
        out = _bmm(ctx, wo)                                   # (H, B*Lq, D)
        acc = out[0]                                          # sum over heads
        for hd in range(1, H):
            acc = acc + out[hd]
        return acc + bo

    # --- self attention (single fused QKV projection) + residual + norm1 ---
    qkv = heads(x, wqkv1_ref[...])                            # (H, B*Lt, 3*Dk)
    h_attn = attention_core(qkv[..., :Dk], qkv[..., Dk:2 * Dk], qkv[..., 2 * Dk:],
                            Lt, Lt, wo1_ref[...], bo1)
    h = _layernorm(x + h_attn, g1, be1)

    # --- source-target attention (fused KV projection) + residual + norm2 ---
    q2 = heads(h, wq2_ref[...])                               # (H, B*Lt, Dk)
    kv2 = heads(hs, wkv2_ref[...])                            # (H, B*Ls, 2*Dk)
    z_attn = attention_core(q2, kv2[..., :Dk], kv2[..., Dk:],
                            Lt, Ls, wo2_ref[...], bo2)
    z = _layernorm(h + z_attn, g2, be2)

    # --- position-wise FFN + residual + norm3 ---
    ff = jnp.dot(z, wf1_ref[...], preferred_element_type=jnp.float32) + bf1
    ff = jnp.maximum(ff, 0.0)
    ff = jnp.dot(ff, wf2_ref[...], preferred_element_type=jnp.float32) + bf2
    y = _layernorm(z + ff, g3, be3)

    y_ref[...] = y.astype(y_ref.dtype)


def prepare_params(raw_params):
    """One-time wrapper-side re-layout of the per-head PyTorch-style weights.

    raw layout:  wq/wk/wv (H, D, Dk), wo (H, Dk, D), biases (1, D)/(1, Dff).
    kernel layout:
      self-attn:  Wqkv (H, D, 3*Dk)   (Q columns pre-scaled by 1/sqrt(Dk))
      cross-attn: Wq   (H, D, Dk) (pre-scaled), Wkv (H, D, 2*Dk)
      output proj: Wo  (H, Dk, D)     (unchanged)
      small vectors: one packed (10, max(D, Dff)) array.
    """
    (wq1, wk1, wv1, wo1, bo1, g1, be1,
     wq2, wk2, wv2, wo2, bo2, g2, be2,
     wf1, bf1, wf2, bf2, g3, be3) = raw_params
    H, D, Dk = wq1.shape
    Dff = wf1.shape[1]
    scale = 1.0 / jnp.sqrt(jnp.float32(Dk))

    wqkv1 = jnp.concatenate([wq1 * scale, wk1, wv1], axis=-1)   # (H, D, 3*Dk)
    wq2s = wq2 * scale                                          # (H, D, Dk)
    wkv2 = jnp.concatenate([wk2, wv2], axis=-1)                 # (H, D, 2*Dk)

    DV = max(D, Dff)

    def pad(v):
        return jnp.pad(v, ((0, 0), (0, DV - v.shape[1])))

    vecs = jnp.concatenate(
        [pad(bo1), pad(g1), pad(be1), pad(bo2), pad(g2), pad(be2),
         pad(bf1), pad(bf2), pad(g3), pad(be3)], axis=0)        # (10, DV)

    return H, [wqkv1, wo1, wq2s, wkv2, wo2, wf1, wf2, vecs]


def decoder_layer(x, hs, kernel_params, num_heads):
    """kernel_params: flat list already prepared by prepare_params."""
    B, Lt, D = x.shape
    _, Ls, _ = hs.shape
    Dk = D // num_heads
    Dff = kernel_params[5].shape[1]    # wf1: (D, Dff)

    kernel = functools.partial(
        decoder_layer_kernel,
        B=B, Lt=Lt, Ls=Ls, H=num_heads, Dk=Dk, D=D, Dff=Dff)

    # Single invocation, no grid: every operand is small enough to live whole
    # in VMEM, so there is nothing to pipeline / double-buffer.
    y_flat = pl.pallas_call(
        kernel,
        out_shape=jax.ShapeDtypeStruct((B * Lt, D), jnp.float32),
    )(x.reshape(B * Lt, D), hs.reshape(B * Ls, D), *kernel_params)

    return y_flat.reshape(B, Lt, D)


# ---------------------------------------------------------------------------
# Pure-JAX reference of the same math (for a correctness check) — uses the
# raw per-head parameter layout, independent of the kernel's re-layout.
# ---------------------------------------------------------------------------
def reference(x, hs, p):
    (wq1, wk1, wv1, wo1, bo1, g1, be1,
     wq2, wk2, wv2, wo2, bo2, g2, be2,
     wf1, bf1, wf2, bf2, g3, be3) = p

    def mha(q_in, kv_in, wq, wk, wv, wo, bo):
        dk = wq.shape[-1]
        q = jnp.einsum('bld,hdk->bhlk', q_in, wq)
        k = jnp.einsum('bld,hdk->bhlk', kv_in, wk)
        v = jnp.einsum('bld,hdk->bhlk', kv_in, wv)
        s = jnp.einsum('bhqk,bhlk->bhql', q, k) / jnp.sqrt(jnp.float32(dk))
        a = jax.nn.softmax(s, axis=-1)
        ctx = jnp.einsum('bhql,bhlk->bhqk', a, v)
        return jnp.einsum('bhqk,hkd->bqd', ctx, wo) + bo[0]

    def ln(v, g, b):
        mu = jnp.mean(v, -1, keepdims=True)
        var = jnp.mean((v - mu) ** 2, -1, keepdims=True)
        return (v - mu) * jax.lax.rsqrt(var + LN_EPS) * g[0] + b[0]

    h = ln(x + mha(x, x, wq1, wk1, wv1, wo1, bo1), g1, be1)
    z = ln(h + mha(h, hs, wq2, wk2, wv2, wo2, bo2), g2, be2)
    ff = jnp.maximum(z @ wf1 + bf1[0], 0.0) @ wf2 + bf2[0]
    return ln(z + ff, g3, be3)


if __name__ == "__main__":
    # Small, module-consistent shapes: h=4 heads, d_model=32, d_ff=64, seq=8.
    B, Lt, Ls = 2, 8, 8
    H, D, Dff = 4, 32, 64
    Dk = D // H

    key = jax.random.PRNGKey(0)
    keys = jax.random.split(key, 16)

    def rnd(k, shape, scale=0.05):
        return (scale * jax.random.normal(k, shape)).astype(jnp.float32)

    x = rnd(keys[0], (B, Lt, D), 1.0)
    hs = rnd(keys[1], (B, Ls, D), 1.0)

    raw_params = [
        # self-attention
        rnd(keys[2], (H, D, Dk)), rnd(keys[3], (H, D, Dk)), rnd(keys[4], (H, D, Dk)),
        rnd(keys[5], (H, Dk, D)), rnd(keys[6], (1, D)),
        jnp.ones((1, D), jnp.float32), jnp.zeros((1, D), jnp.float32),   # norm1
        # src-tgt attention
        rnd(keys[7], (H, D, Dk)), rnd(keys[8], (H, D, Dk)), rnd(keys[9], (H, D, Dk)),
        rnd(keys[10], (H, Dk, D)), rnd(keys[11], (1, D)),
        jnp.ones((1, D), jnp.float32), jnp.zeros((1, D), jnp.float32),   # norm2
        # FFN
        rnd(keys[12], (D, Dff)), rnd(keys[13], (1, Dff)),
        rnd(keys[14], (Dff, D)), rnd(keys[15], (1, D)),
        jnp.ones((1, D), jnp.float32), jnp.zeros((1, D), jnp.float32),   # norm3
    ]

    # One-time weight re-layout / fusion / scale folding (outside the kernel).
    num_heads, kernel_params = prepare_params(raw_params)
    kernel_params = [jax.block_until_ready(p) for p in kernel_params]

    y = decoder_layer(x, hs, kernel_params, num_heads)
    y = jax.block_until_ready(y)

    y_ref = reference(x, hs, raw_params)
    assert y.shape == (B, Lt, D)
    # Tolerance slightly looser than f32-exact because the softmax denominator
    # uses the EUP approximate reciprocal (relative error ~1e-4).
    assert jnp.allclose(y, y_ref, atol=2e-3, rtol=2e-3), "mismatch vs JAX reference"

    print("KERNEL_OK")
</pallas_src>

<mosaic_0001>
module attributes {stable_mosaic.version = 11 : i64} {
  func.func @decoder_layer_kernel(%arg0: memref<16x32xf32, #tpu.memory_space<vmem>>, %arg1: memref<16x32xf32, #tpu.memory_space<vmem>>, %arg2: memref<4x32x24xf32, #tpu.memory_space<vmem>>, %arg3: memref<4x8x32xf32, #tpu.memory_space<vmem>>, %arg4: memref<4x32x8xf32, #tpu.memory_space<vmem>>, %arg5: memref<4x32x16xf32, #tpu.memory_space<vmem>>, %arg6: memref<4x8x32xf32, #tpu.memory_space<vmem>>, %arg7: memref<32x64xf32, #tpu.memory_space<vmem>>, %arg8: memref<64x32xf32, #tpu.memory_space<vmem>>, %arg9: memref<10x64xf32, #tpu.memory_space<vmem>>, %arg10: memref<16x32xf32, #tpu.memory_space<vmem>>) attributes {dimension_semantics = [], scalar_prefetch = 0 : i64, scratch_operands = 0 : i64, tpu.core_type = #tpu.core_type<tc>} {
    %c0 = arith.constant 0 : index
    %c0_0 = arith.constant 0 : index
    %0 = vector.load %arg0[%c0, %c0_0] : memref<16x32xf32, #tpu.memory_space<vmem>>, vector<16x32xf32>
    %c0_1 = arith.constant 0 : index
    %c0_2 = arith.constant 0 : index
    %1 = vector.load %arg1[%c0_1, %c0_2] : memref<16x32xf32, #tpu.memory_space<vmem>>, vector<16x32xf32>
    %c0_3 = arith.constant 0 : index
    %c0_4 = arith.constant 0 : index
    %2 = vector.load %arg9[%c0_3, %c0_4] : memref<10x64xf32, #tpu.memory_space<vmem>>, vector<10x64xf32>
    %3 = vector.extract_strided_slice %2 {offsets = [0, 0], sizes = [1, 32], strides = [1, 1]} : vector<10x64xf32> to vector<1x32xf32>
    %4 = vector.extract_strided_slice %2 {offsets = [1, 0], sizes = [1, 32], strides = [1, 1]} : vector<10x64xf32> to vector<1x32xf32>
    %5 = vector.extract_strided_slice %2 {offsets = [2, 0], sizes = [1, 32], strides = [1, 1]} : vector<10x64xf32> to vector<1x32xf32>
    %6 = vector.extract_strided_slice %2 {offsets = [3, 0], sizes = [1, 32], strides = [1, 1]} : vector<10x64xf32> to vector<1x32xf32>
    %7 = vector.extract_strided_slice %2 {offsets = [4, 0], sizes = [1, 32], strides = [1, 1]} : vector<10x64xf32> to vector<1x32xf32>
    %8 = vector.extract_strided_slice %2 {offsets = [5, 0], sizes = [1, 32], strides = [1, 1]} : vector<10x64xf32> to vector<1x32xf32>
    %9 = vector.extract_strided_slice %2 {offsets = [6, 0], sizes = [1, 64], strides = [1, 1]} : vector<10x64xf32> to vector<1x64xf32>
    %10 = vector.extract_strided_slice %2 {offsets = [7, 0], sizes = [1, 32], strides = [1, 1]} : vector<10x64xf32> to vector<1x32xf32>
    %11 = vector.extract_strided_slice %2 {offsets = [8, 0], sizes = [1, 32], strides = [1, 1]} : vector<10x64xf32> to vector<1x32xf32>
    %12 = vector.extract_strided_slice %2 {offsets = [9, 0], sizes = [1, 32], strides = [1, 1]} : vector<10x64xf32> to vector<1x32xf32>
    %c0_5 = arith.constant 0 : index
    %c0_6 = arith.constant 0 : index
    %c0_7 = arith.constant 0 : index
    %13 = vector.load %arg2[%c0_5, %c0_6, %c0_7] : memref<4x32x24xf32, #tpu.memory_space<vmem>>, vector<4x32x24xf32>
    %14 = vector.shape_cast %0 : vector<16x32xf32> to vector<1x16x32xf32>
    %15 = vector.shape_cast %14 : vector<1x16x32xf32> to vector<1x16x32xf32>
    %16 = vector.broadcast %15 : vector<1x16x32xf32> to vector<4x16x32xf32>
    %cst = arith.constant dense<0.000000e+00> : vector<4x16x24xf32>
    %17 = tpu.matmul %16, %13, %cst {dimension_numbers = #tpu.dot_dimension_numbers<[2], [1], [1], [2], [0, 0, 0, 1, 1, 2], [0], [0]>} : vector<4x16x32xf32>, vector<4x32x24xf32>, vector<4x16x24xf32> -> vector<4x16x24xf32>
    %18 = vector.extract_strided_slice %17 {offsets = [0, 0, 0], sizes = [4, 16, 8], strides = [1, 1, 1]} : vector<4x16x24xf32> to vector<4x16x8xf32>
    %19 = vector.extract_strided_slice %17 {offsets = [0, 0, 8], sizes = [4, 16, 8], strides = [1, 1, 1]} : vector<4x16x24xf32> to vector<4x16x8xf32>
    %20 = vector.extract_strided_slice %17 {offsets = [0, 0, 16], sizes = [4, 16, 8], strides = [1, 1, 1]} : vector<4x16x24xf32> to vector<4x16x8xf32>
    %c0_8 = arith.constant 0 : index
    %c0_9 = arith.constant 0 : index
    %c0_10 = arith.constant 0 : index
    %21 = vector.load %arg3[%c0_8, %c0_9, %c0_10] : memref<4x8x32xf32, #tpu.memory_space<vmem>>, vector<4x8x32xf32>
    %22 = vector.shape_cast %18 : vector<4x16x8xf32> to vector<8x8x8xf32>
    %23 = vector.shape_cast %19 : vector<4x16x8xf32> to vector<8x8x8xf32>
    %24 = vector.shape_cast %20 : vector<4x16x8xf32> to vector<8x8x8xf32>
    %cst_11 = arith.constant dense<0.000000e+00> : vector<8x8x8xf32>
    %25 = tpu.matmul %22, %23, %cst_11 {dimension_numbers = #tpu.dot_dimension_numbers<[2], [2], [1], [1], [0, 0, 0, 1, 1, 1], [0], [0]>} : vector<8x8x8xf32>, vector<8x8x8xf32>, vector<8x8x8xf32> -> vector<8x8x8xf32>
    %cst_12 = arith.constant dense<0xFF800000> : vector<8x8xf32>
    %26 = vector.multi_reduction <maximumf>, %25, %cst_12 [2] : vector<8x8x8xf32> to vector<8x8xf32>
    %27 = vector.shape_cast %26 : vector<8x8xf32> to vector<8x8x1xf32>
    %28 = vector.broadcast %27 : vector<8x8x1xf32> to vector<8x8x8xf32>
    %29 = arith.subf %25, %28 : vector<8x8x8xf32>
    %30 = math.exp %29 : vector<8x8x8xf32>
    %cst_13 = arith.constant dense<0.000000e+00> : vector<8x8xf32>
    %31 = vector.multi_reduction <add>, %30, %cst_13 [2] : vector<8x8x8xf32> to vector<8x8xf32>
    %32 = vector.shape_cast %31 : vector<8x8xf32> to vector<8x8x1xf32>
    %33 = tpu.reciprocal %32 {approx = true} : vector<8x8x1xf32> -> vector<8x8x1xf32>
    %34 = vector.broadcast %33 : vector<8x8x1xf32> to vector<8x8x8xf32>
    %35 = arith.mulf %30, %34 : vector<8x8x8xf32>
    %cst_14 = arith.constant dense<0.000000e+00> : vector<8x8x8xf32>
    %36 = tpu.matmul %35, %24, %cst_14 {dimension_numbers = #tpu.dot_dimension_numbers<[2], [1], [1], [2], [0, 0, 0, 1, 1, 2], [0], [0]>} : vector<8x8x8xf32>, vector<8x8x8xf32>, vector<8x8x8xf32> -> vector<8x8x8xf32>
    %37 = vector.shape_cast %36 : vector<8x8x8xf32> to vector<4x16x8xf32>
    %cst_15 = arith.constant dense<0.000000e+00> : vector<4x16x32xf32>
    %38 = tpu.matmul %37, %21, %cst_15 {dimension_numbers = #tpu.dot_dimension_numbers<[2], [1], [1], [2], [0, 0, 0, 1, 1, 2], [0], [0]>} : vector<4x16x8xf32>, vector<4x8x32xf32>, vector<4x16x32xf32> -> vector<4x16x32xf32>
    %39 = vector.extract_strided_slice %38 {offsets = [0, 0, 0], sizes = [1, 16, 32], strides = [1, 1, 1]} : vector<4x16x32xf32> to vector<1x16x32xf32>
    %40 = vector.shape_cast %39 : vector<1x16x32xf32> to vector<16x32xf32>
    %41 = vector.extract_strided_slice %38 {offsets = [1, 0, 0], sizes = [1, 16, 32], strides = [1, 1, 1]} : vector<4x16x32xf32> to vector<1x16x32xf32>
    %42 = vector.shape_cast %41 : vector<1x16x32xf32> to vector<16x32xf32>
    %43 = arith.addf %40, %42 : vector<16x32xf32>
    %44 = vector.extract_strided_slice %38 {offsets = [2, 0, 0], sizes = [1, 16, 32], strides = [1, 1, 1]} : vector<4x16x32xf32> to vector<1x16x32xf32>
    %45 = vector.shape_cast %44 : vector<1x16x32xf32> to vector<16x32xf32>
    %46 = arith.addf %43, %45 : vector<16x32xf32>
    %47 = vector.extract_strided_slice %38 {offsets = [3, 0, 0], sizes = [1, 16, 32], strides = [1, 1, 1]} : vector<4x16x32xf32> to vector<1x16x32xf32>
    %48 = vector.shape_cast %47 : vector<1x16x32xf32> to vector<16x32xf32>
    %49 = arith.addf %46, %48 : vector<16x32xf32>
    %50 = vector.broadcast %3 : vector<1x32xf32> to vector<16x32xf32>
    %51 = arith.addf %49, %50 : vector<16x32xf32>
    %52 = arith.addf %0, %51 : vector<16x32xf32>
    %cst_16 = arith.constant dense<0.000000e+00> : vector<16xf32>
    %53 = vector.multi_reduction <add>, %52, %cst_16 [1] : vector<16x32xf32> to vector<16xf32>
    %54 = vector.shape_cast %53 : vector<16xf32> to vector<16x1xf32>
    %cst_17 = arith.constant 3.200000e+01 : f32
    %55 = vector.broadcast %cst_17 : f32 to vector<16x1xf32>
    %56 = arith.divf %54, %55 : vector<16x1xf32>
    %57 = vector.broadcast %56 : vector<16x1xf32> to vector<16x32xf32>
    %58 = arith.subf %52, %57 : vector<16x32xf32>
    %59 = arith.mulf %58, %58 : vector<16x32xf32>
    %cst_18 = arith.constant dense<0.000000e+00> : vector<16xf32>
    %60 = vector.multi_reduction <add>, %59, %cst_18 [1] : vector<16x32xf32> to vector<16xf32>
    %61 = vector.shape_cast %60 : vector<16xf32> to vector<16x1xf32>
    %cst_19 = arith.constant 3.200000e+01 : f32
    %62 = vector.broadcast %cst_19 : f32 to vector<16x1xf32>
    %63 = arith.divf %61, %62 : vector<16x1xf32>
    %64 = vector.broadcast %56 : vector<16x1xf32> to vector<16x32xf32>
    %65 = arith.subf %52, %64 : vector<16x32xf32>
    %cst_20 = arith.constant 9.99999974E-6 : f32
    %66 = vector.broadcast %cst_20 : f32 to vector<16x1xf32>
    %67 = arith.addf %63, %66 : vector<16x1xf32>
    %68 = math.rsqrt %67 : vector<16x1xf32>
    %69 = vector.broadcast %68 : vector<16x1xf32> to vector<16x32xf32>
    %70 = arith.mulf %65, %69 : vector<16x32xf32>
    %71 = vector.broadcast %4 : vector<1x32xf32> to vector<16x32xf32>
    %72 = arith.mulf %70, %71 : vector<16x32xf32>
    %73 = vector.broadcast %5 : vector<1x32xf32> to vector<16x32xf32>
    %74 = arith.addf %72, %73 : vector<16x32xf32>
    %c0_21 = arith.constant 0 : index
    %c0_22 = arith.constant 0 : index
    %c0_23 = arith.constant 0 : index
    %75 = vector.load %arg4[%c0_21, %c0_22, %c0_23] : memref<4x32x8xf32, #tpu.memory_space<vmem>>, vector<4x32x8xf32>
    %76 = vector.shape_cast %74 : vector<16x32xf32> to vector<1x16x32xf32>
    %77 = vector.shape_cast %76 : vector<1x16x32xf32> to vector<1x16x32xf32>
    %78 = vector.broadcast %77 : vector<1x16x32xf32> to vector<4x16x32xf32>
    %cst_24 = arith.constant dense<0.000000e+00> : vector<4x16x8xf32>
    %79 = tpu.matmul %78, %75, %cst_24 {dimension_numbers = #tpu.dot_dimension_numbers<[2], [1], [1], [2], [0, 0, 0, 1, 1, 2], [0], [0]>} : vector<4x16x32xf32>, vector<4x32x8xf32>, vector<4x16x8xf32> -> vector<4x16x8xf32>
    %c0_25 = arith.constant 0 : index
    %c0_26 = arith.constant 0 : index
    %c0_27 = arith.constant 0 : index
    %80 = vector.load %arg5[%c0_25, %c0_26, %c0_27] : memref<4x32x16xf32, #tpu.memory_space<vmem>>, vector<4x32x16xf32>
    %81 = vector.shape_cast %1 : vector<16x32xf32> to vector<1x16x32xf32>
    %82 = vector.shape_cast %81 : vector<1x16x32xf32> to vector<1x16x32xf32>
    %83 = vector.broadcast %82 : vector<1x16x32xf32> to vector<4x16x32xf32>
    %cst_28 = arith.constant dense<0.000000e+00> : vector<4x16x16xf32>
    %84 = tpu.matmul %83, %80, %cst_28 {dimension_numbers = #tpu.dot_dimension_numbers<[2], [1], [1], [2], [0, 0, 0, 1, 1, 2], [0], [0]>} : vector<4x16x32xf32>, vector<4x32x16xf32>, vector<4x16x16xf32> -> vector<4x16x16xf32>
    %85 = vector.extract_strided_slice %84 {offsets = [0, 0, 0], sizes = [4, 16, 8], strides = [1, 1, 1]} : vector<4x16x16xf32> to vector<4x16x8xf32>
    %86 = vector.extract_strided_slice %84 {offsets = [0, 0, 8], sizes = [4, 16, 8], strides = [1, 1, 1]} : vector<4x16x16xf32> to vector<4x16x8xf32>
    %c0_29 = arith.constant 0 : index
    %c0_30 = arith.constant 0 : index
    %c0_31 = arith.constant 0 : index
    %87 = vector.load %arg6[%c0_29, %c0_30, %c0_31] : memref<4x8x32xf32, #tpu.memory_space<vmem>>, vector<4x8x32xf32>
    %88 = vector.shape_cast %79 : vector<4x16x8xf32> to vector<8x8x8xf32>
    %89 = vector.shape_cast %85 : vector<4x16x8xf32> to vector<8x8x8xf32>
    %90 = vector.shape_cast %86 : vector<4x16x8xf32> to vector<8x8x8xf32>
    %cst_32 = arith.constant dense<0.000000e+00> : vector<8x8x8xf32>
    %91 = tpu.matmul %88, %89, %cst_32 {dimension_numbers = #tpu.dot_dimension_numbers<[2], [2], [1], [1], [0, 0, 0, 1, 1, 1], [0], [0]>} : vector<8x8x8xf32>, vector<8x8x8xf32>, vector<8x8x8xf32> -> vector<8x8x8xf32>
    %cst_33 = arith.constant dense<0xFF800000> : vector<8x8xf32>
    %92 = vector.multi_reduction <maximumf>, %91, %cst_33 [2] : vector<8x8x8xf32> to vector<8x8xf32>
    %93 = vector.shape_cast %92 : vector<8x8xf32> to vector<8x8x1xf32>
    %94 = vector.broadcast %93 : vector<8x8x1xf32> to vector<8x8x8xf32>
    %95 = arith.subf %91, %94 : vector<8x8x8xf32>
    %96 = math.exp %95 : vector<8x8x8xf32>
    %cst_34 = arith.constant dense<0.000000e+00> : vector<8x8xf32>
    %97 = vector.multi_reduction <add>, %96, %cst_34 [2] : vector<8x8x8xf32> to vector<8x8xf32>
    %98 = vector.shape_cast %97 : vector<8x8xf32> to vector<8x8x1xf32>
    %99 = tpu.reciprocal %98 {approx = true} : vector<8x8x1xf32> -> vector<8x8x1xf32>
    %100 = vector.broadcast %99 : vector<8x8x1xf32> to vector<8x8x8xf32>
    %101 = arith.mulf %96, %100 : vector<8x8x8xf32>
    %cst_35 = arith.constant dense<0.000000e+00> : vector<8x8x8xf32>
    %102 = tpu.matmul %101, %90, %cst_35 {dimension_numbers = #tpu.dot_dimension_numbers<[2], [1], [1], [2], [0, 0, 0, 1, 1, 2], [0], [0]>} : vector<8x8x8xf32>, vector<8x8x8xf32>, vector<8x8x8xf32> -> vector<8x8x8xf32>
    %103 = vector.shape_cast %102 : vector<8x8x8xf32> to vector<4x16x8xf32>
    %cst_36 = arith.constant dense<0.000000e+00> : vector<4x16x32xf32>
    %104 = tpu.matmul %103, %87, %cst_36 {dimension_numbers = #tpu.dot_dimension_numbers<[2], [1], [1], [2], [0, 0, 0, 1, 1, 2], [0], [0]>} : vector<4x16x8xf32>, vector<4x8x32xf32>, vector<4x16x32xf32> -> vector<4x16x32xf32>
    %105 = vector.extract_strided_slice %104 {offsets = [0, 0, 0], sizes = [1, 16, 32], strides = [1, 1, 1]} : vector<4x16x32xf32> to vector<1x16x32xf32>
    %106 = vector.shape_cast %105 : vector<1x16x32xf32> to vector<16x32xf32>
    %107 = vector.extract_strided_slice %104 {offsets = [1, 0, 0], sizes = [1, 16, 32], strides = [1, 1, 1]} : vector<4x16x32xf32> to vector<1x16x32xf32>
    %108 = vector.shape_cast %107 : vector<1x16x32xf32> to vector<16x32xf32>
    %109 = arith.addf %106, %108 : vector<16x32xf32>
    %110 = vector.extract_strided_slice %104 {offsets = [2, 0, 0], sizes = [1, 16, 32], strides = [1, 1, 1]} : vector<4x16x32xf32> to vector<1x16x32xf32>
    %111 = vector.shape_cast %110 : vector<1x16x32xf32> to vector<16x32xf32>
    %112 = arith.addf %109, %111 : vector<16x32xf32>
    %113 = vector.extract_strided_slice %104 {offsets = [3, 0, 0], sizes = [1, 16, 32], strides = [1, 1, 1]} : vector<4x16x32xf32> to vector<1x16x32xf32>
    %114 = vector.shape_cast %113 : vector<1x16x32xf32> to vector<16x32xf32>
    %115 = arith.addf %112, %114 : vector<16x32xf32>
    %116 = vector.broadcast %6 : vector<1x32xf32> to vector<16x32xf32>
    %117 = arith.addf %115, %116 : vector<16x32xf32>
    %118 = arith.addf %74, %117 : vector<16x32xf32>
    %cst_37 = arith.constant dense<0.000000e+00> : vector<16xf32>
    %119 = vector.multi_reduction <add>, %118, %cst_37 [1] : vector<16x32xf32> to vector<16xf32>
    %120 = vector.shape_cast %119 : vector<16xf32> to vector<16x1xf32>
    %cst_38 = arith.constant 3.200000e+01 : f32
    %121 = vector.broadcast %cst_38 : f32 to vector<16x1xf32>
    %122 = arith.divf %120, %121 : vector<16x1xf32>
    %123 = vector.broadcast %122 : vector<16x1xf32> to vector<16x32xf32>
    %124 = arith.subf %118, %123 : vector<16x32xf32>
    %125 = arith.mulf %124, %124 : vector<16x32xf32>
    %cst_39 = arith.constant dense<0.000000e+00> : vector<16xf32>
    %126 = vector.multi_reduction <add>, %125, %cst_39 [1] : vector<16x32xf32> to vector<16xf32>
    %127 = vector.shape_cast %126 : vector<16xf32> to vector<16x1xf32>
    %cst_40 = arith.constant 3.200000e+01 : f32
    %128 = vector.broadcast %cst_40 : f32 to vector<16x1xf32>
    %129 = arith.divf %127, %128 : vector<16x1xf32>
    %130 = vector.broadcast %122 : vector<16x1xf32> to vector<16x32xf32>
    %131 = arith.subf %118, %130 : vector<16x32xf32>
    %cst_41 = arith.constant 9.99999974E-6 : f32
    %132 = vector.broadcast %cst_41 : f32 to vector<16x1xf32>
    %133 = arith.addf %129, %132 : vector<16x1xf32>
    %134 = math.rsqrt %133 : vector<16x1xf32>
    %135 = vector.broadcast %134 : vector<16x1xf32> to vector<16x32xf32>
    %136 = arith.mulf %131, %135 : vector<16x32xf32>
    %137 = vector.broadcast %7 : vector<1x32xf32> to vector<16x32xf32>
    %138 = arith.mulf %136, %137 : vector<16x32xf32>
    %139 = vector.broadcast %8 : vector<1x32xf32> to vector<16x32xf32>
    %140 = arith.addf %138, %139 : vector<16x32xf32>
    %c0_42 = arith.constant 0 : index
    %c0_43 = arith.constant 0 : index
    %141 = vector.load %arg7[%c0_42, %c0_43] : memref<32x64xf32, #tpu.memory_space<vmem>>, vector<32x64xf32>
    %cst_44 = arith.constant dense<0.000000e+00> : vector<16x64xf32>
    %142 = tpu.matmul %140, %141, %cst_44 {dimension_numbers = #tpu.dot_dimension_numbers<[1], [0], [0], [1], [0, 0, 1, 1], [], []>} : vector<16x32xf32>, vector<32x64xf32>, vector<16x64xf32> -> vector<16x64xf32>
    %143 = vector.broadcast %9 : vector<1x64xf32> to vector<16x64xf32>
    %144 = arith.addf %142, %143 : vector<16x64xf32>
    %cst_45 = arith.constant 0.000000e+00 : f32
    %145 = vector.broadcast %cst_45 : f32 to vector<16x64xf32>
    %146 = arith.maximumf %144, %145 : vector<16x64xf32>
    %c0_46 = arith.constant 0 : index
    %c0_47 = arith.constant 0 : index
    %147 = vector.load %arg8[%c0_46, %c0_47] : memref<64x32xf32, #tpu.memory_space<vmem>>, vector<64x32xf32>
    %cst_48 = arith.constant dense<0.000000e+00> : vector<16x32xf32>
    %148 = tpu.matmul %146, %147, %cst_48 {dimension_numbers = #tpu.dot_dimension_numbers<[1], [0], [0], [1], [0, 0, 1, 1], [], []>} : vector<16x64xf32>, vector<64x32xf32>, vector<16x32xf32> -> vector<16x32xf32>
    %149 = vector.broadcast %10 : vector<1x32xf32> to vector<16x32xf32>
    %150 = arith.addf %148, %149 : vector<16x32xf32>
    %151 = arith.addf %140, %150 : vector<16x32xf32>
    %cst_49 = arith.constant dense<0.000000e+00> : vector<16xf32>
    %152 = vector.multi_reduction <add>, %151, %cst_49 [1] : vector<16x32xf32> to vector<16xf32>
    %153 = vector.shape_cast %152 : vector<16xf32> to vector<16x1xf32>
    %cst_50 = arith.constant 3.200000e+01 : f32
    %154 = vector.broadcast %cst_50 : f32 to vector<16x1xf32>
    %155 = arith.divf %153, %154 : vector<16x1xf32>
    %156 = vector.broadcast %155 : vector<16x1xf32> to vector<16x32xf32>
    %157 = arith.subf %151, %156 : vector<16x32xf32>
    %158 = arith.mulf %157, %157 : vector<16x32xf32>
    %cst_51 = arith.constant dense<0.000000e+00> : vector<16xf32>
    %159 = vector.multi_reduction <add>, %158, %cst_51 [1] : vector<16x32xf32> to vector<16xf32>
    %160 = vector.shape_cast %159 : vector<16xf32> to vector<16x1xf32>
    %cst_52 = arith.constant 3.200000e+01 : f32
    %161 = vector.broadcast %cst_52 : f32 to vector<16x1xf32>
    %162 = arith.divf %160, %161 : vector<16x1xf32>
    %163 = vector.broadcast %155 : vector<16x1xf32> to vector<16x32xf32>
    %164 = arith.subf %151, %163 : vector<16x32xf32>
    %cst_53 = arith.constant 9.99999974E-6 : f32
    %165 = vector.broadcast %cst_53 : f32 to vector<16x1xf32>
    %166 = arith.addf %162, %165 : vector<16x1xf32>
    %167 = math.rsqrt %166 : vector<16x1xf32>
    %168 = vector.broadcast %167 : vector<16x1xf32> to vector<16x32xf32>
    %169 = arith.mulf %164, %168 : vector<16x32xf32>
    %170 = vector.broadcast %11 : vector<1x32xf32> to vector<16x32xf32>
    %171 = arith.mulf %169, %170 : vector<16x32xf32>
    %172 = vector.broadcast %12 : vector<1x32xf32> to vector<16x32xf32>
    %173 = arith.addf %171, %172 : vector<16x32xf32>
    %c0_54 = arith.constant 0 : index
    %c0_55 = arith.constant 0 : index
    %174 = vector.load %arg10[%c0_54, %c0_55] : memref<16x32xf32, #tpu.memory_space<vmem>>, vector<16x32xf32>
    tpu.vector_store %arg10[%c0_54, %c0_55], %173 {strides = array<i32>} : memref<16x32xf32, #tpu.memory_space<vmem>>, vector<16x32xf32>,
    return
  }
}

</mosaic_0001>

<bundles_post_ra>
// kernel: tpu_custom_call.1
= control target key start
LH: loop header
LB: loop body
LE: loop exit
PB: predicated region body
PF: predicated region fallthrough
CT: control target
= control target key end

     0   :  { %vm58_vm0 = vcmask 261120   ;;  %s6050_s0 = inlined_call_operand.vmem [shape: f32[16,32], index: 0, kind: input, shape index: {}]   ;;  %s6051_s1 = inlined_call_operand.vmem [shape: f32[16,32], index: 1, kind: input, shape index: {}]   ;;  %s6052_s2 = inlined_call_operand.vmem [shape: f32[4,32,24], index: 2, kind: input, shape index: {}]   ;;  %s6053_s3 = inlined_call_operand.vmem [shape: f32[4,8,32], index: 3, kind: input, shape index: {}]   ;;  %s6054_s4 = inlined_call_operand.vmem [shape: f32[4,32,8], index: 4, kind: input, shape index: {}]   ;;  %s6055_s5 = inlined_call_operand.vmem [shape: f32[4,32,16], index: 5, kind: input, shape index: {}]   ;;  %s6056_s6 = inlined_call_operand.vmem [shape: f32[4,8,32], index: 6, kind: input, shape index: {}]   ;;  %s6057_s7 = inlined_call_operand.vmem [shape: f32[32,64], index: 7, kind: input, shape index: {}]   ;;  %s6058_s8 = inlined_call_operand.vmem [shape: f32[64,32], index: 8, kind: input, shape index: {}]   ;;  %s6059_s9 = inlined_call_operand.vmem [shape: f32[10,64], index: 9, kind: input, shape index: {}]   ;;  %s6060_s10 = inlined_call_operand.hbm [shape: f32[16,32], index: 10, kind: output, shape index: {}]  }
   0x1   :  { %v45_v0 = vld [vmem:[%s6052_s2 + $0x18] sm:$0xff]  ;;  %v44_v2 = vld [vmem:[%s6052_s2 + $0x10] sm:$0xff]  ;;  %v43_v4 = vld [vmem:[%s6052_s2 + $0x8] sm:$0xff] }
   0x2   :  { %v49_v1 = vld [vmem:[%s6052_s2 + $0x38] sm:$0xff]  ;;  %4898 = vmatprep.subr.mxu0 %v45_v0  ;;  %v48_v3 = vld [vmem:[%s6052_s2 + $0x30] sm:$0xff]  ;;  %v47_v5 = vld [vmem:[%s6052_s2 + $0x28] sm:$0xff] }
   0x3   :  { %4909 = vmatprep.subr.mxu1 %v49_v1  ;;  %4899 = vmatpush3.msra.mxu0 %v45_v0  ;;  %v42_v6 = vld [vmem:[%s6052_s2] sm:$0xff] }
   0x4   :  { %4910 = vmatpush3.msra.mxu1 %v49_v1  ;;  %4900 = vmatprep.subr.mxu0 %v44_v2  ;;  %v46_v7 = vld [vmem:[%s6052_s2 + $0x20] sm:$0xff] }
   0x5   :  { %4911 = vmatprep.subr.mxu1 %v48_v3  ;;  %4901 = vmatpush3.msra.mxu0 %v44_v2  ;;  %v5455_v8 = vld [vmem:[%s6050_s0] sm:$0xff] }
   0x6   :  { %4912 = vmatpush3.msra.mxu1 %v48_v3  ;;  %4902 = vmatprep.subr.mxu0 %v43_v4 }
   0x7   :  { %4913 = vmatprep.subr.mxu1 %v47_v5  ;;  %4903 = vmatpush3.msra.mxu0 %v43_v4 }
   0x8   :  { %4914 = vmatpush3.msra.mxu1 %v47_v5 }
   0x9   :  { %15 = vsyncpa [#allocation3], 0  ;;  %4904 = vmatprep.subr.mxu0 %v42_v6  ;;  %4915 = vmatprep.subr.mxu1 %v46_v7  ;;  %v5460_v9 = vld [vmem:[%s6050_s0 + $0x8] sm:$0xff]  ;;  %v53_v10 = vld [vmem:[%s6052_s2 + $0x58] sm:$0xff]  ;;  %v5366_v18 = vmov 0.0   ;;  %vm5367_vm1 = vmmov 0  }
   0xa   :  { %4905 = vmatpush3.msra.mxu0 %v42_v6  ;;  %4906 = vmatprep.mubr.msk.f32.mxu0 %vm58_vm0, %v5455_v8  ;;  %v57_v11 = vld [vmem:[%s6052_s2 + $0x78] sm:$0xff]  ;;  %v52_v12 = vld [vmem:[%s6052_s2 + $0x50] sm:$0xff]  ;;  %v51_v14 = vld [vmem:[%s6052_s2 + $0x48] sm:$0xff]  ;;  %vm372_vm2 = vcmask 64512   ;;  %s5369_s28 = smov 112   ;;  %vm4490_vm3 = vcmask 523264  }
   0xb   :  { %4916 = vmatpush3.msra.mxu1 %v46_v7  ;;  %4917 = vmatprep.mubr.msk.f32.mxu1 %vm58_vm0, %v5455_v8  ;;  %v56_v13 = vld [vmem:[%s6052_s2 + $0x70] sm:$0xff]  ;;  %v55_v15 = vld [vmem:[%s6052_s2 + $0x68] sm:$0xff]  ;;  %v50_v16 = vld [vmem:[%s6052_s2 + $0x40] sm:$0xff]  ;;  %s5370_s21 = smov [#allocation2]  }
   0xc   :  { %4907 = vmatmul.mubr.msk.f32.vlgmr.msra.gmra.mxu0 %vm58_vm0, %v5460_v9  ;;  %4918 = vmatmul.mubr.msk.f32.vlgmr.msra.gmra.mxu1 %vm58_vm0, %v5460_v9  ;;  %v54_v17 = vld [vmem:[%s6052_s2 + $0x60] sm:$0xff]  ;;  %s5368_s2 = smov 120  }
   0xd   :  { %4920 = vmatprep.subr.mxu0 %v53_v10  ;;  %4931 = vmatprep.subr.mxu1 %v57_v11 }
   0xe   :  { %4921 = vmatpush3.msra.mxu0 %v53_v10  ;;  %4932 = vmatpush3.msra.mxu1 %v57_v11 }
   0xf   :  { %4922 = vmatprep.subr.mxu0 %v52_v12  ;;  %4933 = vmatprep.subr.mxu1 %v56_v13 }
  0x10   :  { %4923 = vmatpush3.msra.mxu0 %v52_v12  ;;  %4928 = vmatprep.mubr.msk.f32.mxu0 %vm58_vm0, %v5455_v8 }
  0x11   :  { %4924 = vmatprep.subr.mxu0 %v51_v14  ;;  %4934 = vmatpush3.msra.mxu1 %v56_v13 }
  0x12   :  { %4925 = vmatpush3.msra.mxu0 %v51_v14  ;;  %4935 = vmatprep.subr.mxu1 %v55_v15 }
  0x13   :  { %4926 = vmatprep.subr.mxu0 %v50_v16  ;;  %4936 = vmatpush3.msra.mxu1 %v55_v15 }
  0x14   :  { %4927 = vmatpush3.msra.mxu0 %v50_v16  ;;  %4937 = vmatprep.subr.mxu1 %v54_v17 }
  0x15   :  { %4929 = vmatmul.mubr.msk.f32.vlgmr.msra.gmra.mxu0 %vm58_vm0, %v5460_v9  ;;  %4938 = vmatpush3.msra.mxu1 %v54_v17 }
  0x16   :  { %4939 = vmatprep.mubr.msk.f32.mxu1 %vm58_vm0, %v5455_v8  ;;  %4942 = vmatprep.subr.mxu0 %v5366_v18 }
  0x17   :  { %4940 = vmatmul.mubr.msk.f32.vlgmr.msra.gmra.mxu1 %vm58_vm0, %v5460_v9  ;;  %4957 = vmatprep.subr.mxu1 %v5366_v18 }
  0x18   :  { %4944 = vmatprep.mubr.msk.f32.mxu0 %vm5367_vm1, %v5366_v18  ;;  %4959 = vmatprep.mubr.msk.f32.mxu1 %vm5367_vm1, %v5366_v18 }
  0xcc   :  { %v5508_v19 = vpop.f32.mrf.mxu0  ;;  %v5510_v20 = vpop.f32.mrf.mxu1 }
  0xce   :  { %v5512_v21 = vpop.f32.mrf.mxu0  ;;  %v5514_v22 = vpop.f32.mrf.mxu1 }
  0xcf   :  { %525 = vrot.lane.b32.xlu1 %v5514_v22, %s5368_s2  ;;  %370 = vrot.lane.b32.xlu0 %v5512_v21, %s5368_s2 }
  0xd3   :  { %602 = vrot.lane.b32.xlu1 %v5510_v20, %s5368_s2  ;;  %448 = vrot.lane.b32.xlu0 %v5508_v19, %s5368_s2 }
  0xd5   :  { %v5524_v23 = vpop.f32.mrf.mxu0 }
  0xd7   :  { %756 = vrot.lane.b32.xlu1 %v5524_v23, %s5368_s2  ;;  %v5528_v24 = vpop.f32.mrf.mxu0  ;;  %v5530_v25 = vpop.f32.mrf.mxu1 }
  0xd8   :  { %679 = vrot.lane.b32.xlu0 %v5528_v24, %s5368_s2 }
  0xd9   :  { %v5534_v26 = vpop.f32.mrf.mxu1 }
  0xdb   :  { %910 = vrot.lane.b32.xlu1 %v5530_v25, %s5368_s2 }
  0xdc   :  { %833 = vrot.lane.b32.xlu0 %v5534_v26, %s5368_s2 }
 0x141   :  { %v526_v27 = vpop.permute.xlu1 %525  ;;  %v371_v28 = vpop.permute.xlu0 %370 }
 0x142   :  { %4943 = vmatpush3.xpose.msk.msra.mxu0 %vm372_vm2, %v371_v28 }
 0x143   :  { %4947 = vmatprep.subr.mxu0 %v5366_v18 }
 0x145   :  { %v603_v29 = vpop.permute.xlu1 %602  ;;  %4945 = vmatmul.mubr.msk.f32.vlgmr.msra.gmra.mxu0 %vm372_vm2, %v5512_v21  ;;  %v449_v30 = vpop.permute.xlu0 %448 }
 0x146   :  { %4948 = vmatpush3.xpose.msk.msra.mxu0 %vm372_vm2, %v449_v30  ;;  %4958 = vmatpush3.xpose.msk.msra.mxu1 %vm372_vm2, %v603_v29 }
 0x147   :  { %4949 = vmatprep.mubr.msk.f32.mxu0 %vm5367_vm1, %v5366_v18  ;;  %4952 = vmatprep.subr.mxu0 %v5366_v18 }
 0x148   :  { %4967 = vmatprep.subr.mxu1 %v5366_v18 }
 0x149   :  { %4950 = vmatmul.mubr.msk.f32.vlgmr.msra.gmra.mxu0 %vm372_vm2, %v5508_v19  ;;  %4960 = vmatmul.mubr.msk.f32.vlgmr.msra.gmra.mxu1 %vm372_vm2, %v5510_v20  ;;  %v757_v31 = vpop.permute.xlu1 %756 }
 0x14a   :  { %4953 = vmatpush3.xpose.msk.msra.mxu0 %vm372_vm2, %v526_v27  ;;  %4968 = vmatpush3.xpose.msk.msra.mxu1 %vm372_vm2, %v757_v31  ;;  %v680_v32 = vpop.permute.xlu0 %679 }
 0x14b   :  { %4954 = vmatprep.mubr.msk.f32.mxu0 %vm5367_vm1, %v5366_v18  ;;  %4969 = vmatprep.mubr.msk.f32.mxu1 %vm5367_vm1, %v5366_v18 }
 0x14c   :  { %4962 = vmatprep.subr.mxu0 %v5366_v18  ;;  %4977 = vmatprep.subr.mxu1 %v5366_v18 }
 0x14d   :  { %4955 = vmatmul.mubr.msk.f32.vlgmr.msra.gmra.mxu0 %vm372_vm2, %v5514_v22  ;;  %4970 = vmatmul.mubr.msk.f32.vlgmr.msra.gmra.mxu1 %vm372_vm2, %v5524_v23  ;;  %v911_v33 = vpop.permute.xlu1 %910 }
 0x14e   :  { %4963 = vmatpush3.xpose.msk.msra.mxu0 %vm372_vm2, %v680_v32  ;;  %4978 = vmatpush3.xpose.msk.msra.mxu1 %vm372_vm2, %v911_v33  ;;  %v834_v34 = vpop.permute.xlu0 %833 }
 0x14f   :  { %4964 = vmatprep.mubr.msk.f32.mxu0 %vm5367_vm1, %v5366_v18  ;;  %4979 = vmatprep.mubr.msk.f32.mxu1 %vm5367_vm1, %v5366_v18 }
 0x150   :  { %4972 = vmatprep.subr.mxu0 %v5366_v18  ;;  %4987 = vmatprep.subr.mxu1 %v5366_v18 }
 0x151   :  { %4965 = vmatmul.mubr.msk.f32.vlgmr.msra.gmra.mxu0 %vm372_vm2, %v5528_v24  ;;  %4980 = vmatmul.mubr.msk.f32.vlgmr.msra.gmra.mxu1 %vm372_vm2, %v5530_v25 }
 0x152   :  { %4973 = vmatpush3.xpose.msk.msra.mxu0 %vm372_vm2, %v834_v34  ;;  %4974 = vmatprep.mubr.msk.f32.mxu0 %vm5367_vm1, %v5366_v18 }
 0x153   :  { %4982 = vmatprep.subr.mxu0 %v5366_v18  ;;  %4989 = vmatprep.mubr.msk.f32.mxu1 %vm5367_vm1, %v5366_v18 }
 0x155   :  { %4975 = vmatmul.mubr.msk.f32.vlgmr.msra.gmra.mxu0 %vm372_vm2, %v5534_v26 }
 0x156   :  { %4984 = vmatprep.mubr.msk.f32.mxu0 %vm5367_vm1, %v5366_v18 }
 0x205   :  { %v443_v35 = vpop.f32.mrf.mxu0 }
 0x206   :  { %v986_v36 = vsel %vm372_vm2, %v443_v35, -inf }
 0x207   :  { %987 = vmax.xlane.f32.xlu0 %v986_v36  ;;  %v4946_v37 = vpop.f32.mrf.mxu0 }
 0x209   :  { %v520_v38 = vpop.f32.mrf.mxu0  ;;  %v674_v39 = vpop.f32.mrf.mxu1 }
 0x20a   :  { %v989_v40 = vsel %vm372_vm2, %v520_v38, -inf  ;;  %v995_v50 = vsel %vm372_vm2, %v674_v39, -inf }
 0x20b   :  { %v4961_v41 = vpop.f32.mrf.mxu1  ;;  %990 = vmax.xlane.f32.xlu1 %v989_v40  ;;  %v4951_v42 = vpop.f32.mrf.mxu0 }
 0x20d   :  { %v597_v43 = vpop.f32.mrf.mxu0  ;;  %v828_v44 = vpop.f32.mrf.mxu1 }
 0x20e   :  { %v992_v45 = vsel %vm372_vm2, %v597_v43, -inf  ;;  %v1001_v55 = vsel %vm372_vm2, %v828_v44, -inf }
 0x20f   :  { %v4971_v46 = vpop.f32.mrf.mxu1  ;;  %993 = vmax.xlane.f32.xlu0 %v992_v45  ;;  %v4956_v47 = vpop.f32.mrf.mxu0 }
 0x211   :  { %v751_v48 = vpop.f32.mrf.mxu0  ;;  %v982_v49 = vpop.f32.mrf.mxu1 }
 0x212   :  { %v998_v51 = vsel %vm372_vm2, %v751_v48, -inf  ;;  %v1007_v58 = vsel %vm372_vm2, %v982_v49, -inf }
 0x213   :  { %v4981_v52 = vpop.f32.mrf.mxu1  ;;  %996 = vmax.xlane.f32.xlu0 %v995_v50  ;;  %999 = vmax.xlane.f32.xlu1 %v998_v51  ;;  %v4966_v53 = vpop.f32.mrf.mxu0 }
 0x215   :  { %v905_v54 = vpop.f32.mrf.mxu0 }
 0x216   :  { %v1004_v56 = vsel %vm372_vm2, %v905_v54, -inf }
 0x217   :  { %1002 = vmax.xlane.f32.xlu0 %v1001_v55  ;;  %1005 = vmax.xlane.f32.xlu1 %v1004_v56  ;;  %v4976_v57 = vpop.f32.mrf.mxu0 }
 0x21b   :  { %1008 = vmax.xlane.f32.xlu0 %v1007_v58 }
 0x228   :  { %1074 = vrot.lane.b32.xlu1 %v5512_v21, %s5369_s28 }
 0x22c   :  { %1226 = vrot.lane.b32.xlu1 %v5514_v22, %s5369_s28 }
 0x230   :  { %1302 = vrot.lane.b32.xlu1 %v5510_v20, %s5369_s28 }
 0x231   :  { %1150 = vrot.lane.b32.xlu0 %v5508_v19, %s5369_s28 }
 0x234   :  { %1454 = vrot.lane.b32.xlu1 %v5524_v23, %s5369_s28 }
 0x235   :  { %1378 = vrot.lane.b32.xlu0 %v5528_v24, %s5369_s28 }
 0x290   :  { %v988_v59 = vpop.xlane.xlu0 %987 }
 0x291   :  { %v1010_v60 = vsub.f32 %v443_v35, %v988_v59 }
 0x293   :  { %v1018_v61 = vmul.f32 1.442695, %v1010_v60 }
 0x294   :  { %v991_v62 = vpop.xlane.xlu1 %990 }
 0x295   :  { %5267 = vpow2.f32 %v1018_v61  ;;  %v1011_v1 = vsub.f32 %v520_v38, %v991_v62 }
 0x297   :  { %v1020_v7 = vmul.f32 1.442695, %v1011_v1 }
 0x298   :  { %v994_v63 = vpop.xlane.xlu0 %993 }
 0x299   :  { %v1012_v0 = vsub.f32 %v597_v43, %v994_v63 }
 0x29b   :  { %v1022_v2 = vmul.f32 1.442695, %v1012_v0 }
 0x29c   :  { %v997_v3 = vpop.xlane.xlu0 %996  ;;  %v1000_v4 = vpop.xlane.xlu1 %999 }
 0x29d   :  { %5269 = vpow2.f32 %v1022_v2  ;;  %v1013_v5 = vsub.f32 %v674_v39, %v997_v3  ;;  %v1014_v6 = vsub.f32 %v751_v48, %v1000_v4 }
 0x29f   :  { %v1024_v10 = vmul.f32 1.442695, %v1013_v5  ;;  %v1026_v11 = vmul.f32 1.442695, %v1014_v6  ;;  %v365_v6 = vld [vmem:[%s6053_s3] sm:$0xff] }
 0x2a0   :  { %v1003_v12 = vpop.xlane.xlu0 %1002  ;;  %v1006_v13 = vpop.xlane.xlu1 %1005 }
 0x2a1   :  { %5271 = vpow2.f32 %v1024_v10  ;;  %v1015_v14 = vsub.f32 %v828_v44, %v1003_v12  ;;  %v1016_v15 = vsub.f32 %v905_v54, %v1006_v13  ;;  %v367_v10 = vld [vmem:[%s6053_s3 + $0x10] sm:$0xff] }
 0x2a2   :  { %v5268_v16 = vpop.eup %5267  ;;  %5273 = vpow2.f32 %v1026_v11  ;;  %v368_v11 = vld [vmem:[%s6053_s3 + $0x18] sm:$0xff] }
 0x2a3   :  { %5275 = vpow2.f32 %v1020_v7  ;;  %v1028_v17 = vmul.f32 1.442695, %v1015_v14  ;;  %v1030_v19 = vmul.f32 1.442695, %v1016_v15  ;;  %v1034_v20 = vsel %vm372_vm2, %v5268_v16, 0.0  ;;  %v366_v7 = vld [vmem:[%s6053_s3 + $0x8] sm:$0xff] }
 0x2a4   :  { %v1009_v21 = vpop.xlane.xlu0 %1008  ;;  %1035 = vadd.xlane.f32.xlu1 %v1034_v20  ;;  %v1075_v22 = vpop.permute.xlu1 %1074 }
 0x2a5   :  { %v1017_v23 = vsub.f32 %v982_v49, %v1009_v21  ;;  %4983 = vmatpush3.msra.mxu0 %v1075_v22  ;;  %5277 = vpow2.f32 %v1030_v19 }
 0x2a6   :  { %4992 = vmatprep.subr.mxu0 %v5366_v18  ;;  %5279 = vpow2.f32 %v1028_v17 }
 0x2a7   :  { %v1032_v24 = vmul.f32 1.442695, %v1017_v23 }
 0x2a8   :  { %v1151_v27 = vpop.permute.xlu0 %1150  ;;  %v1227_v42 = vpop.permute.xlu1 %1226 }
 0x2a9   :  { %4988 = vmatpush3.msra.mxu1 %v1151_v27  ;;  %5281 = vpow2.f32 %v1032_v24 }
 0x2aa   :  { %v5270_v28 = vpop.eup %5269  ;;  %4997 = vmatprep.subr.mxu1 %v5366_v18 }
 0x2ab   :  { %v1040_v29 = vsel %vm372_vm2, %v5270_v28, 0.0 }
 0x2ac   :  { %1041 = vadd.xlane.f32.xlu1 %v1040_v29  ;;  %v1303_v43 = vpop.permute.xlu1 %1302  ;;  %v1379_v46 = vpop.permute.xlu0 %1378 }
 0x2ae   :  { %v5612_v30 = vpop.eup %5271 }
 0x2af   :  { %v5274_v31 = vpop.eup %5273  ;;  %v1043_v32 = vsel %vm372_vm2, %v5612_v30, 0.0 }
 0x2b0   :  { %v5276_v33 = vpop.eup %5275  ;;  %1044 = vadd.xlane.f32.xlu0 %v1043_v32  ;;  %v1046_v34 = vsel %vm372_vm2, %v5274_v31, 0.0  ;;  %v1455_v44 = vpop.permute.xlu1 %1454 }
 0x2b1   :  { %1047 = vadd.xlane.f32.xlu1 %v1046_v34  ;;  %v1037_v36 = vsel %vm372_vm2, %v5276_v33, 0.0 }
 0x2b2   :  { %v5278_v35 = vpop.eup %5277 }
 0x2b3   :  { %v5618_v37 = vpop.eup %5279  ;;  %v1052_v38 = vsel %vm372_vm2, %v5278_v35, 0.0 }
 0x2b4   :  { %1038 = vadd.xlane.f32.xlu0 %v1037_v36  ;;  %v1049_v39 = vsel %vm372_vm2, %v5618_v37, 0.0 }
 0x2b5   :  { %1053 = vadd.xlane.f32.xlu1 %v1052_v38 }
 0x2b6   :  { %v5623_v40 = vpop.eup %5281 }
 0x2b7   :  { %v1055_v41 = vsel %vm372_vm2, %v5623_v40, 0.0 }
 0x2b8   :  { %1050 = vadd.xlane.f32.xlu0 %v1049_v39  ;;  %v5684_v39 = vld [vmem:[%s6059_s9] sm:$0xff] }
 0x2bc   :  { %1056 = vadd.xlane.f32.xlu0 %v1055_v41 }
 0x2c6   :  { %1606 = vrot.lane.b32.xlu1 %v5530_v25, %s5369_s28 }
 0x2d2   :  { %1530 = vrot.lane.b32.xlu0 %v5534_v26, %s5369_s28 }
 0x32d   :  { %v1036_v45 = vpop.xlane.xlu1 %1035 }
 0x32e   :  { %5283 = vrcp.f32 %v1036_v45 }
 0x335   :  { %v1042_v47 = vpop.xlane.xlu1 %1041 }
 0x336   :  { %5285 = vrcp.f32 %v1042_v47 }
 0x339   :  { %v1045_v48 = vpop.xlane.xlu0 %1044 }
 0x33a   :  { %v1048_v49 = vpop.xlane.xlu1 %1047 }
 0x33b   :  { %v5284_v50 = vpop.eup %5283  ;;  %5287 = vrcp.f32 %v1048_v49 }
 0x33c   :  { %v1066_v51 = vmul.f32 %v5284_v50, %v5268_v16 }
 0x33d   :  { %v1039_v52 = vpop.xlane.xlu0 %1038 }
 0x33e   :  { %5289 = vrcp.f32 %v1039_v52  ;;  %v1054_v53 = vpop.xlane.xlu1 %1053  ;;  %4985 = vmatmul.mubr.msk.f32.vlgmr.msra.gmra.mxu0 %vm372_vm2, %v1066_v51 }
 0x33f   :  { %5291 = vrcp.f32 %v1054_v53  ;;  %4993 = vmatpush3.msra.mxu0 %v1227_v42  ;;  %4994 = vmatprep.mubr.msk.f32.mxu0 %vm5367_vm1, %v5366_v18 }
 0x340   :  { %5293 = vrcp.f32 %v1045_v48  ;;  %5002 = vmatprep.subr.mxu0 %v5366_v18 }
 0x341   :  { %v1051_v25 = vpop.xlane.xlu0 %1050 }
 0x342   :  { %5295 = vrcp.f32 %v1051_v25  ;;  %v1607_v4 = vpop.permute.xlu1 %1606 }
 0x343   :  { %v5286_v26 = vpop.eup %5285 }
 0x344   :  { %v1068_v54 = vmul.f32 %v5286_v26, %v5270_v28 }
 0x345   :  { %v1057_v55 = vpop.xlane.xlu0 %1056 }
 0x346   :  { %4995 = vmatmul.mubr.msk.f32.vlgmr.msra.gmra.mxu0 %vm372_vm2, %v1068_v54  ;;  %5297 = vrcp.f32 %v1057_v55 }
 0x347   :  { %5003 = vmatpush3.msra.mxu0 %v1379_v46  ;;  %5004 = vmatprep.mubr.msk.f32.mxu0 %vm5367_vm1, %v5366_v18 }
 0x348   :  { %v5288_v56 = vpop.eup %5287  ;;  %5012 = vmatprep.subr.mxu0 %v5366_v18 }
 0x349   :  { %v1531_v57 = vpop.permute.xlu0 %1530  ;;  %v1070_v58 = vmul.f32 %v5288_v56, %v5274_v31  ;;  %v2012_v31 = vlaneseq }
 0x34b   :  { %v5290_v59 = vpop.eup %5289  ;;  %5005 = vmatmul.mubr.msk.f32.vlgmr.msra.gmra.mxu0 %vm372_vm2, %v1070_v58 }
 0x34c   :  { %v5292_v60 = vpop.eup %5291  ;;  %5013 = vmatpush3.msra.mxu0 %v1531_v57  ;;  %5014 = vmatprep.mubr.msk.f32.mxu0 %vm5367_vm1, %v5366_v18  ;;  %v1067_v61 = vmul.f32 %v5290_v59, %v5276_v33  ;;  %v5678_v33 = vshrl.u32 %v2012_v31, 7  ;;  %v2069_v31 = vld [vmem:[%s6054_s4 + $0x50] sm:$0xff] }
 0x34d   :  { %v5294_v62 = vpop.eup %5293  ;;  %v1072_v63 = vmul.f32 %v5292_v60, %v5278_v35  ;;  %5022 = vmatprep.subr.mxu0 %v365_v6 }
 0x34e   :  { %4990 = vmatmul.mubr.msk.f32.vlgmr.msra.gmra.mxu1 %vm372_vm2, %v1067_v61  ;;  %v1069_v0 = vmul.f32 %v5294_v62, %v5612_v30  ;;  %v2014_v36 = vsub.s32 0, %v5678_v33 }
 0x34f   :  { %4998 = vmatpush3.msra.mxu1 %v1303_v43  ;;  %5015 = vmatmul.mubr.msk.f32.vlgmr.msra.gmra.mxu0 %vm372_vm2, %v1072_v63  ;;  %v5296_v1 = vpop.eup %5295  ;;  %v2066_v63 = vld [vmem:[%s6054_s4 + $0x38] sm:$0xff] }
 0x350   :  { %4999 = vmatprep.mubr.msk.f32.mxu1 %vm5367_vm1, %v5366_v18  ;;  %5007 = vmatprep.subr.mxu1 %v5366_v18  ;;  %v1071_v2 = vmul.f32 %v5296_v1, %v5618_v37  ;;  %v2065_v1 = vld [vmem:[%s6054_s4 + $0x30] sm:$0xff] }
 0x351   :  { %5023 = vmatpush3.msra.mxu0 %v365_v6  ;;  %v2070_v6 = vld [vmem:[%s6054_s4 + $0x58] sm:$0xff] }
 0x352   :  { %5000 = vmatmul.mubr.msk.f32.vlgmr.msra.gmra.mxu1 %vm372_vm2, %v1069_v0  ;;  %5032 = vmatprep.subr.mxu0 %v367_v10  ;;  %v2061_v0 = vld [vmem:[%s6054_s4 + $0x10] sm:$0xff] }
 0x353   :  { %5008 = vmatpush3.msra.mxu1 %v1455_v44  ;;  %5009 = vmatprep.mubr.msk.f32.mxu1 %vm5367_vm1, %v5366_v18  ;;  %v5298_v3 = vpop.eup %5297  ;;  %v2015_v44 = vrot.slane %v5684_v39, %v2014_v36 }
 0x354   :  { %5017 = vmatprep.subr.mxu1 %v5366_v18  ;;  %v1073_v5 = vmul.f32 %v5298_v3, %v5623_v40  ;;  %v2064_v3 = vld [vmem:[%s6054_s4 + $0x28] sm:$0xff] }
 0x356   :  { %5010 = vmatmul.mubr.msk.f32.vlgmr.msra.gmra.mxu1 %vm372_vm2, %v1071_v2  ;;  %v2060_v2 = vld [vmem:[%s6054_s4 + $0x8] sm:$0xff] }
 0x357   :  { %5018 = vmatpush3.msra.mxu1 %v1607_v4  ;;  %5019 = vmatprep.mubr.msk.f32.mxu1 %vm5367_vm1, %v5366_v18  ;;  %v2059_v4 = vld [vmem:[%s6054_s4] sm:$0xff] }
 0x358   :  { %5027 = vmatprep.subr.mxu1 %v366_v7 }
 0x35a   :  { %5020 = vmatmul.mubr.msk.f32.vlgmr.msra.gmra.mxu1 %vm372_vm2, %v1073_v5  ;;  %v2063_v5 = vld [vmem:[%s6054_s4 + $0x20] sm:$0xff] }
 0x35b   :  { %5028 = vmatpush3.msra.mxu1 %v366_v7  ;;  %v2074_v7 = vld [vmem:[%s6054_s4 + $0x78] sm:$0xff] }
 0x35c   :  { %5037 = vmatprep.subr.mxu1 %v368_v11 }
 0x3fe   :  { %v1146_v12 = vpop.f32.mrf.mxu0 }
 0x3ff   :  { %5024 = vmatprep.mubr.msk.f32.mxu0 %vm372_vm2, %v1146_v12 }
 0x400   :  { %v4986_v13 = vpop.f32.mrf.mxu0 }
 0x406   :  { %v1298_v14 = vpop.f32.mrf.mxu0 }
 0x407   :  { %5029 = vmatprep.mubr.msk.f32.mxu1 %vm372_vm2, %v1298_v14 }
 0x408   :  { %v4996_v15 = vpop.f32.mrf.mxu0 }
 0x40b   :  { %v1450_v16 = vpop.f32.mrf.mxu0 }
 0x40d   :  { %v5006_v17 = vpop.f32.mrf.mxu0 }
 0x40e   :  { %v1222_v19 = vpop.f32.mrf.mxu1  ;;  %v2055_v17 = vsub.s32 2, %v5678_v33 }
 0x40f   :  { %v1602_v20 = vpop.f32.mrf.mxu0  ;;  %5025 = vmatmul.mubr.msk.f32.vlgmr.msra.gmra.mxu0 %vm372_vm2, %v1222_v19 }
 0x410   :  { %v4991_v21 = vpop.f32.mrf.mxu1  ;;  %5034 = vmatprep.mubr.msk.f32.mxu0 %vm372_vm2, %v1450_v16  ;;  %5033 = vmatpush3.msra.mxu0 %v367_v10  ;;  %v2049_v16 = vsub.s32 1, %v5678_v33 }
 0x411   :  { %v5016_v22 = vpop.f32.mrf.mxu0 }
 0x412   :  { %v1374_v23 = vpop.f32.mrf.mxu1  ;;  %v2050_v19 = vrot.slane %v5684_v39, %v2049_v16  ;;  %v2056_v22 = vrot.slane %v5684_v39, %v2055_v17 }
 0x413   :  { %5030 = vmatmul.mubr.msk.f32.vlgmr.msra.gmra.mxu1 %vm372_vm2, %v1374_v23 }
 0x414   :  { %v5001_v24 = vpop.f32.mrf.mxu1  ;;  %5039 = vmatprep.mubr.msk.f32.mxu1 %vm372_vm2, %v1602_v20  ;;  %5038 = vmatpush3.msra.mxu1 %v368_v11 }
 0x415   :  { %5053 = vmatprep.subr.mxu1 %v2066_v63 }
 0x416   :  { %v1526_v27 = vpop.f32.mrf.mxu1 }
 0x417   :  { %5035 = vmatmul.mubr.msk.f32.vlgmr.msra.gmra.mxu0 %vm372_vm2, %v1526_v27 }
 0x418   :  { %v5011_v28 = vpop.f32.mrf.mxu1 }
 0x41a   :  { %v1678_v29 = vpop.f32.mrf.mxu1 }
 0x41b   :  { %5040 = vmatmul.mubr.msk.f32.vlgmr.msra.gmra.mxu1 %vm372_vm2, %v1678_v29 }
 0x41c   :  { %v5021_v30 = vpop.f32.mrf.mxu1  ;;  %5054 = vmatpush3.msra.mxu1 %v2066_v63 }
 0x41d   :  { %5055 = vmatprep.subr.mxu1 %v2065_v1 }
 0x41e   :  { %5056 = vmatpush3.msra.mxu1 %v2065_v1 }
 0x41f   :  { %5057 = vmatprep.subr.mxu1 %v2064_v3 }
 0x420   :  { %5058 = vmatpush3.msra.mxu1 %v2064_v3 }
 0x421   :  { %5059 = vmatprep.subr.mxu1 %v2063_v5 }
 0x422   :  { %5060 = vmatpush3.msra.mxu1 %v2063_v5 }
 0x423   :  { %5075 = vmatprep.subr.mxu1 %v2074_v7 }
 0x4cf   :  { %v5026_v32 = vpop.f32.mrf.mxu0 }
 0x4d1   :  { %v1754_v35 = vpop.f32.mrf.mxu0 }
 0x4d3   :  { %v5031_v34 = vpop.f32.mrf.mxu1 }
 0x4d4   :  { %v2007_v40 = vadd.f32 %v5031_v34, %v5026_v32  ;;  %v2073_v32 = vld [vmem:[%s6054_s4 + $0x70] sm:$0xff]  ;;  %v2068_v34 = vld [vmem:[%s6054_s4 + $0x48] sm:$0xff] }
 0x4d5   :  { %v1835_v37 = vpop.f32.mrf.mxu1 }
 0x4d6   :  { %v2006_v42 = vadd.f32 %v1835_v37, %v1754_v35  ;;  %v2072_v35 = vld [vmem:[%s6054_s4 + $0x68] sm:$0xff]  ;;  %v2067_v37 = vld [vmem:[%s6054_s4 + $0x40] sm:$0xff] }
 0x4d7   :  { %v5036_v38 = vpop.f32.mrf.mxu0 }
 0x4d8   :  { %v2009_v43 = vadd.f32 %v5036_v38, %v2007_v40  ;;  %v2071_v38 = vld [vmem:[%s6054_s4 + $0x60] sm:$0xff]  ;;  %v2384_v40 = vld [vmem:[%s6055_s5 + $0x18] sm:$0xff] }
 0x4d9   :  { %v1916_v41 = vpop.f32.mrf.mxu0 }
 0x4da   :  { %v2008_v46 = vadd.f32 %v2006_v42, %v1916_v41  ;;  %v2388_v41 = vld [vmem:[%s6055_s5 + $0x38] sm:$0xff]  ;;  %v2383_v42 = vld [vmem:[%s6055_s5 + $0x10] sm:$0xff] }
 0x4db   :  { %v5041_v45 = vpop.f32.mrf.mxu1 }
 0x4dc   :  { %v2011_v47 = vadd.f32 %v5041_v45, %v2009_v43  ;;  %v2387_v43 = vld [vmem:[%s6055_s5 + $0x30] sm:$0xff]  ;;  %v2386_v45 = vld [vmem:[%s6055_s5 + $0x28] sm:$0xff] }
 0x4dd   :  { %v1997_v48 = vpop.f32.mrf.mxu1 }
 0x4de   :  { %v2017_v49 = vadd.f32 %v2015_v44, %v2011_v47  ;;  %v2010_v50 = vadd.f32 %v2008_v46, %v1997_v48  ;;  %v38_v46 = vld [vmem:[%s6051_s1] sm:$0xff] }
 0x4df   :  { %v2381_v47 = vld [vmem:[%s6055_s5] sm:$0xff] }
 0x4e0   :  { %v2016_v51 = vadd.f32 %v2015_v44, %v2010_v50  ;;  %v2019_v52 = vadd.f32 %v2017_v49, %v5460_v9  ;;  %v2382_v44 = vld [vmem:[%s6055_s5 + $0x8] sm:$0xff]  ;;  %v2385_v48 = vld [vmem:[%s6055_s5 + $0x20] sm:$0xff]  ;;  %v2392_v50 = vld [vmem:[%s6055_s5 + $0x58] sm:$0xff] }
 0x4e1   :  { %v39_v49 = vld [vmem:[%s6051_s1 + $0x8] sm:$0xff] }
 0x4e2   :  { %v2023_v53 = vsel %vm58_vm0, %v2019_v52, 0.0  ;;  %v2018_v25 = vadd.f32 %v2016_v51, %v5455_v8  ;;  %v2062_v8 = vld [vmem:[%s6054_s4 + $0x18] sm:$0xff]  ;;  %v2391_v51 = vld [vmem:[%s6055_s5 + $0x50] sm:$0xff] }
 0x4e3   :  { %2024 = vadd.xlane.f32.xlu1 %v2023_v53  ;;  %5042 = vmatprep.subr.mxu0 %v2062_v8  ;;  %v2390_v53 = vld [vmem:[%s6055_s5 + $0x48] sm:$0xff] }
 0x4e4   :  { %v2020_v26 = vsel %vm58_vm0, %v2018_v25, 0.0  ;;  %5043 = vmatpush3.msra.mxu0 %v2062_v8 }
 0x4e5   :  { %2021 = vadd.xlane.f32.xlu0 %v2020_v26  ;;  %5044 = vmatprep.subr.mxu0 %v2061_v0  ;;  %v2389_v26 = vld [vmem:[%s6055_s5 + $0x40] sm:$0xff] }
 0x4e6   :  { %5045 = vmatpush3.msra.mxu0 %v2061_v0 }
 0x4e7   :  { %5046 = vmatprep.subr.mxu0 %v2060_v2 }
 0x4e8   :  { %5047 = vmatpush3.msra.mxu0 %v2060_v2 }
 0x4e9   :  { %5048 = vmatprep.subr.mxu0 %v2059_v4 }
 0x4ea   :  { %5049 = vmatpush3.msra.mxu0 %v2059_v4 }
 0x4eb   :  { %5064 = vmatprep.subr.mxu0 %v2070_v6 }
 0x56c   :  { %v2025_v54 = vpop.xlane.xlu1 %2024 }
 0x56d   :  { %v2028_v55 = vmul.f32 0.03125, %v2025_v54  ;;  %v2394_v54 = vld [vmem:[%s6055_s5 + $0x68] sm:$0xff] }
 0x56e   :  { %v2022_v56 = vpop.xlane.xlu0 %2021 }
 0x56f   :  { %v2027_v57 = vmul.f32 0.03125, %v2022_v56  ;;  %v2030_v58 = vsub.f32 %v2019_v52, %v2028_v55  ;;  %v2396_v52 = vld [vmem:[%s6055_s5 + $0x78] sm:$0xff]  ;;  %v2393_v55 = vld [vmem:[%s6055_s5 + $0x60] sm:$0xff] }
 0x571   :  { %v2029_v59 = vsub.f32 %v2018_v25, %v2027_v57  ;;  %v2032_v62 = vmul.f32 %v2030_v58, %v2030_v58  ;;  %v2395_v25 = vld [vmem:[%s6055_s5 + $0x70] sm:$0xff] }
 0x573   :  { %v2031_v60 = vmul.f32 %v2029_v59, %v2029_v59  ;;  %v2036_v9 = vsel %vm58_vm0, %v2032_v62, 0.0 }
 0x575   :  { %v2033_v61 = vsel %vm58_vm0, %v2031_v60, 0.0 }
 0x576   :  { %2034 = vadd.xlane.f32.xlu0 %v2033_v61 }
 0x57a   :  { %2037 = vadd.xlane.f32.xlu0 %v2036_v9 }
 0x5ff   :  { %v2035_v10 = vpop.xlane.xlu0 %2034 }
 0x600   :  { %v2039_v11 = vmul.f32 0.03125, %v2035_v10 }
 0x602   :  { %v2041_v12 = vadd.f32 1e-05, %v2039_v11 }
 0x603   :  { %v2038_v13 = vpop.xlane.xlu0 %2037 }
 0x604   :  { %5299 = vrsqrt.f32 %v2041_v12  ;;  %v2040_v14 = vmul.f32 0.03125, %v2038_v13 }
 0x606   :  { %v2042_v15 = vadd.f32 1e-05, %v2040_v14 }
 0x608   :  { %5301 = vrsqrt.f32 %v2042_v15 }
 0x611   :  { %v5300_v20 = vpop.eup %5299 }
 0x612   :  { %v2045_v21 = vmul.f32 %v5300_v20, %v2029_v59 }
 0x614   :  { %v2051_v23 = vmul.f32 %v2050_v19, %v2045_v21 }
 0x615   :  { %v5302_v24 = vpop.eup %5301 }
 0x616   :  { %v2046_v27 = vmul.f32 %v5302_v24, %v2030_v58  ;;  %v5731_v28 = vadd.f32 %v2056_v22, %v2051_v23 }
 0x618   :  { %5050 = vmatprep.mubr.msk.f32.mxu0 %vm58_vm0, %v5731_v28  ;;  %5061 = vmatprep.mubr.msk.f32.mxu1 %vm58_vm0, %v5731_v28  ;;  %v2052_v29 = vmul.f32 %v2050_v19, %v2046_v27 }
 0x61a   :  { %v5737_v30 = vadd.f32 %v2056_v22, %v2052_v29 }
 0x61c   :  { %5051 = vmatmul.mubr.msk.f32.vlgmr.msra.gmra.mxu0 %vm58_vm0, %v5737_v30  ;;  %5062 = vmatmul.mubr.msk.f32.vlgmr.msra.gmra.mxu1 %vm58_vm0, %v5737_v30 }
 0x61d   :  { %5065 = vmatpush3.msra.mxu0 %v2070_v6  ;;  %5076 = vmatpush3.msra.mxu1 %v2074_v7 }
 0x61e   :  { %5066 = vmatprep.subr.mxu0 %v2069_v31  ;;  %5072 = vmatprep.mubr.msk.f32.mxu0 %vm58_vm0, %v5731_v28 }
 0x61f   :  { %5077 = vmatprep.subr.mxu1 %v2073_v32  ;;  %5083 = vmatprep.mubr.msk.f32.mxu1 %vm58_vm0, %v5731_v28 }
 0x620   :  { %5067 = vmatpush3.msra.mxu0 %v2069_v31  ;;  %5078 = vmatpush3.msra.mxu1 %v2073_v32 }
 0x621   :  { %5068 = vmatprep.subr.mxu0 %v2068_v34  ;;  %5079 = vmatprep.subr.mxu1 %v2072_v35 }
 0x622   :  { %5069 = vmatpush3.msra.mxu0 %v2068_v34  ;;  %5080 = vmatpush3.msra.mxu1 %v2072_v35 }
 0x623   :  { %5070 = vmatprep.subr.mxu0 %v2067_v37  ;;  %5081 = vmatprep.subr.mxu1 %v2071_v38 }
 0x624   :  { %5071 = vmatpush3.msra.mxu0 %v2067_v37  ;;  %5082 = vmatpush3.msra.mxu1 %v2071_v38 }
 0x625   :  { %5073 = vmatmul.mubr.msk.f32.vlgmr.msra.gmra.mxu0 %vm58_vm0, %v5737_v30  ;;  %5084 = vmatmul.mubr.msk.f32.vlgmr.msra.gmra.mxu1 %vm58_vm0, %v5737_v30 }
 0x626   :  { %5086 = vmatprep.subr.mxu0 %v2384_v40  ;;  %5097 = vmatprep.subr.mxu1 %v2388_v41 }
 0x627   :  { %5087 = vmatpush3.msra.mxu0 %v2384_v40  ;;  %5098 = vmatpush3.msra.mxu1 %v2388_v41 }
 0x628   :  { %5088 = vmatprep.subr.mxu0 %v2383_v42  ;;  %5099 = vmatprep.subr.mxu1 %v2387_v43 }
 0x629   :  { %5089 = vmatpush3.msra.mxu0 %v2383_v42  ;;  %5100 = vmatpush3.msra.mxu1 %v2387_v43 }
 0x62a   :  { %5090 = vmatprep.subr.mxu0 %v2382_v44  ;;  %5101 = vmatprep.subr.mxu1 %v2386_v45 }
 0x62b   :  { %5091 = vmatpush3.msra.mxu0 %v2382_v44  ;;  %5094 = vmatprep.mubr.msk.f32.mxu0 %vm58_vm0, %v38_v46 }
 0x62c   :  { %5092 = vmatprep.subr.mxu0 %v2381_v47  ;;  %5102 = vmatpush3.msra.mxu1 %v2386_v45 }
 0x62d   :  { %5093 = vmatpush3.msra.mxu0 %v2381_v47  ;;  %5103 = vmatprep.subr.mxu1 %v2385_v48 }
 0x62e   :  { %5095 = vmatmul.mubr.msk.f32.vlgmr.msra.gmra.mxu0 %vm58_vm0, %v39_v49  ;;  %5108 = vmatprep.subr.mxu0 %v2392_v50 }
 0x62f   :  { %5104 = vmatpush3.msra.mxu1 %v2385_v48  ;;  %5105 = vmatprep.mubr.msk.f32.mxu1 %vm58_vm0, %v38_v46 }
 0x630   :  { %5109 = vmatpush3.msra.mxu0 %v2392_v50  ;;  %5106 = vmatmul.mubr.msk.f32.vlgmr.msra.gmra.mxu1 %vm58_vm0, %v39_v49 }
 0x631   :  { %5110 = vmatprep.subr.mxu0 %v2391_v51  ;;  %5119 = vmatprep.subr.mxu1 %v2396_v52 }
 0x632   :  { %5111 = vmatpush3.msra.mxu0 %v2391_v51  ;;  %5120 = vmatpush3.msra.mxu1 %v2396_v52 }
 0x633   :  { %5112 = vmatprep.subr.mxu0 %v2390_v53  ;;  %5121 = vmatprep.subr.mxu1 %v2395_v25 }
 0x634   :  { %5113 = vmatpush3.msra.mxu0 %v2390_v53  ;;  %5122 = vmatpush3.msra.mxu1 %v2395_v25 }
 0x635   :  { %5114 = vmatprep.subr.mxu0 %v2389_v26  ;;  %5123 = vmatprep.subr.mxu1 %v2394_v54 }
 0x636   :  { %5115 = vmatpush3.msra.mxu0 %v2389_v26  ;;  %5116 = vmatprep.mubr.msk.f32.mxu0 %vm58_vm0, %v38_v46 }
 0x637   :  { %5124 = vmatpush3.msra.mxu1 %v2394_v54  ;;  %5117 = vmatmul.mubr.msk.f32.vlgmr.msra.gmra.mxu0 %vm58_vm0, %v39_v49 }
 0x638   :  { %5125 = vmatprep.subr.mxu1 %v2393_v55  ;;  %5127 = vmatprep.mubr.msk.f32.mxu1 %vm58_vm0, %v38_v46 }
 0x639   :  { %5126 = vmatpush3.msra.mxu1 %v2393_v55  ;;  %5130 = vmatprep.subr.mxu0 %v5366_v18 }
 0x63a   :  { %5128 = vmatmul.mubr.msk.f32.vlgmr.msra.gmra.mxu1 %vm58_vm0, %v39_v49  ;;  %5135 = vmatprep.subr.mxu1 %v5366_v18 }
 0x63b   :  { %5137 = vmatprep.mubr.msk.f32.mxu1 %vm5367_vm1, %v5366_v18  ;;  %5132 = vmatprep.mubr.msk.f32.mxu0 %vm5367_vm1, %v5366_v18 }
 0x6dc   :  { %v5052_v56 = vpop.f32.mrf.mxu0  ;;  %v5063_v57 = vpop.f32.mrf.mxu1 }
 0x6de   :  { %v2147_v58 = vpop.f32.mrf.mxu0  ;;  %v2222_v59 = vpop.f32.mrf.mxu1 }
 0x6e5   :  { %v5074_v60 = vpop.f32.mrf.mxu0  ;;  %v5085_v61 = vpop.f32.mrf.mxu1 }
 0x6e7   :  { %v2297_v62 = vpop.f32.mrf.mxu0  ;;  %v2372_v9 = vpop.f32.mrf.mxu1 }
 0x6ee   :  { %v5837_v8 = vpop.f32.mrf.mxu0 }
 0x6ef   :  { %5136 = vmatpush3.xpose.msk.msra.mxu1 %vm372_vm2, %v5837_v8 }
 0x6f0   :  { %v5841_v63 = vpop.f32.mrf.mxu0  ;;  %v5843_v0 = vpop.f32.mrf.mxu1  ;;  %5145 = vmatprep.subr.mxu1 %v5366_v18 }
 0x6f1   :  { %5131 = vmatpush3.xpose.msk.msra.mxu0 %vm372_vm2, %v5841_v63 }
 0x6f2   :  { %5138 = vmatmul.mubr.msk.f32.vlgmr.msra.gmra.mxu1 %vm372_vm2, %v5052_v56  ;;  %5140 = vmatprep.subr.mxu0 %v5366_v18  ;;  %v5854_v1 = vpop.f32.mrf.mxu1 }
 0x6f3   :  { %5146 = vmatpush3.xpose.msk.msra.mxu1 %vm372_vm2, %v5843_v0  ;;  %5147 = vmatprep.mubr.msk.f32.mxu1 %vm5367_vm1, %v5366_v18 }
 0x6f4   :  { %5133 = vmatmul.mubr.msk.f32.vlgmr.msra.gmra.mxu0 %vm372_vm2, %v2147_v58  ;;  %5155 = vmatprep.subr.mxu1 %v5366_v18 }
 0x6f5   :  { %5141 = vmatpush3.xpose.msk.msra.mxu0 %vm372_vm2, %v5854_v1  ;;  %5142 = vmatprep.mubr.msk.f32.mxu0 %vm5367_vm1, %v5366_v18 }
 0x6f6   :  { %5148 = vmatmul.mubr.msk.f32.vlgmr.msra.gmra.mxu1 %vm372_vm2, %v5063_v57  ;;  %5150 = vmatprep.subr.mxu0 %v5366_v18 }
 0x6f7   :  { %v5118_v2 = vpop.f32.mrf.mxu0  ;;  %5157 = vmatprep.mubr.msk.f32.mxu1 %vm5367_vm1, %v5366_v18 }
 0x6f8   :  { %5156 = vmatpush3.xpose.msk.msra.mxu1 %vm372_vm2, %v5118_v2  ;;  %5143 = vmatmul.mubr.msk.f32.vlgmr.msra.gmra.mxu0 %vm372_vm2, %v2222_v59 }
 0x6f9   :  { %v2619_v3 = vpop.f32.mrf.mxu0  ;;  %5165 = vmatprep.subr.mxu1 %v5366_v18  ;;  %5152 = vmatprep.mubr.msk.f32.mxu0 %vm5367_vm1, %v5366_v18 }
 0x6fa   :  { %v5871_v4 = vpop.f32.mrf.mxu1  ;;  %5151 = vmatpush3.xpose.msk.msra.mxu0 %vm372_vm2, %v2619_v3 }
 0x6fb   :  { %5158 = vmatmul.mubr.msk.f32.vlgmr.msra.gmra.mxu1 %vm372_vm2, %v5074_v60  ;;  %5160 = vmatprep.subr.mxu0 %v5366_v18 }
 0x6fc   :  { %5166 = vmatpush3.xpose.msk.msra.mxu1 %vm372_vm2, %v5871_v4  ;;  %5167 = vmatprep.mubr.msk.f32.mxu1 %vm5367_vm1, %v5366_v18  ;;  %v5880_v5 = vpop.f32.mrf.mxu1 }
 0x6fd   :  { %5153 = vmatmul.mubr.msk.f32.vlgmr.msra.gmra.mxu0 %vm372_vm2, %v2297_v62  ;;  %5175 = vmatprep.subr.mxu1 %v5366_v18 }
 0x6fe   :  { %5161 = vmatpush3.xpose.msk.msra.mxu0 %vm372_vm2, %v5880_v5  ;;  %5162 = vmatprep.mubr.msk.f32.mxu0 %vm5367_vm1, %v5366_v18 }
 0x6ff   :  { %5168 = vmatmul.mubr.msk.f32.vlgmr.msra.gmra.mxu1 %vm372_vm2, %v5085_v61  ;;  %5170 = vmatprep.subr.mxu0 %v5366_v18 }
 0x700   :  { %5177 = vmatprep.mubr.msk.f32.mxu1 %vm5367_vm1, %v5366_v18 }
 0x701   :  { %5163 = vmatmul.mubr.msk.f32.vlgmr.msra.gmra.mxu0 %vm372_vm2, %v2372_v9 }
 0x702   :  { %5172 = vmatprep.mubr.msk.f32.mxu0 %vm5367_vm1, %v5366_v18 }
 0x7b2   :  { %v2855_v6 = vpop.f32.mrf.mxu1 }
 0x7b3   :  { %v3318_v7 = vsel %vm372_vm2, %v2855_v6, -inf }
 0x7b4   :  { %3319 = vmax.xlane.f32.xlu0 %v3318_v7  ;;  %v2779_v10 = vpop.f32.mrf.mxu0  ;;  %v5139_v11 = vpop.f32.mrf.mxu1 }
 0x7b5   :  { %v3315_v12 = vsel %vm372_vm2, %v2779_v10, -inf }
 0x7b6   :  { %v3007_v13 = vpop.f32.mrf.mxu1  ;;  %3316 = vmax.xlane.f32.xlu1 %v3315_v12  ;;  %v5134_v14 = vpop.f32.mrf.mxu0 }
 0x7b7   :  { %v3324_v15 = vsel %vm372_vm2, %v3007_v13, -inf }
 0x7b8   :  { %3325 = vmax.xlane.f32.xlu0 %v3324_v15  ;;  %v2931_v17 = vpop.f32.mrf.mxu0  ;;  %v5149_v19 = vpop.f32.mrf.mxu1 }
 0x7b9   :  { %v3321_v20 = vsel %vm372_vm2, %v2931_v17, -inf }
 0x7ba   :  { %3322 = vmax.xlane.f32.xlu1 %v3321_v20  ;;  %v5144_v21 = vpop.f32.mrf.mxu0 }
 0x7bb   :  { %v3159_v22 = vpop.f32.mrf.mxu1 }
 0x7bc   :  { %v3330_v23 = vsel %vm372_vm2, %v3159_v22, -inf }
 0x7bd   :  { %3331 = vmax.xlane.f32.xlu0 %v3330_v23  ;;  %v3083_v24 = vpop.f32.mrf.mxu0  ;;  %v5159_v27 = vpop.f32.mrf.mxu1 }
 0x7be   :  { %v3327_v29 = vsel %vm372_vm2, %v3083_v24, -inf }
 0x7bf   :  { %v3311_v31 = vpop.f32.mrf.mxu1  ;;  %3328 = vmax.xlane.f32.xlu1 %v3327_v29  ;;  %v5154_v32 = vpop.f32.mrf.mxu0 }
 0x7c0   :  { %v3336_v34 = vsel %vm372_vm2, %v3311_v31, -inf }
 0x7c1   :  { %3337 = vmax.xlane.f32.xlu0 %v3336_v34  ;;  %v3235_v35 = vpop.f32.mrf.mxu0  ;;  %v5169_v37 = vpop.f32.mrf.mxu1 }
 0x7c2   :  { %v3333_v38 = vsel %vm372_vm2, %v3235_v35, -inf }
 0x7c3   :  { %3334 = vmax.xlane.f32.xlu1 %v3333_v38  ;;  %v5164_v40 = vpop.f32.mrf.mxu0 }
 0x7d4   :  { %3403 = vrot.lane.b32.xlu1 %v5841_v63, %s5368_s2 }
 0x7d7   :  { %3479 = vrot.lane.b32.xlu0 %v5837_v8, %s5368_s2 }
 0x7d8   :  { %3555 = vrot.lane.b32.xlu1 %v5854_v1, %s5368_s2 }
 0x7db   :  { %3707 = vrot.lane.b32.xlu0 %v2619_v3, %s5368_s2 }
 0x7dc   :  { %3631 = vrot.lane.b32.xlu1 %v5843_v0, %s5368_s2 }
 0x7e0   :  { %3783 = vrot.lane.b32.xlu1 %v5118_v2, %s5368_s2 }
 0x83d   :  { %v3320_v41 = vpop.xlane.xlu0 %3319 }
 0x83e   :  { %v3340_v42 = vsub.f32 %v2855_v6, %v3320_v41 }
 0x83f   :  { %v3317_v43 = vpop.xlane.xlu1 %3316 }
 0x840   :  { %v3349_v44 = vmul.f32 1.442695, %v3340_v42  ;;  %v3339_v45 = vsub.f32 %v2779_v10, %v3317_v43 }
 0x841   :  { %v3326_v46 = vpop.xlane.xlu0 %3325 }
 0x842   :  { %5303 = vpow2.f32 %v3349_v44  ;;  %v3347_v47 = vmul.f32 1.442695, %v3339_v45  ;;  %v3342_v48 = vsub.f32 %v3007_v13, %v3326_v46 }
 0x843   :  { %v3323_v49 = vpop.xlane.xlu1 %3322 }
 0x844   :  { %5305 = vpow2.f32 %v3347_v47  ;;  %v3353_v50 = vmul.f32 1.442695, %v3342_v48  ;;  %v3341_v51 = vsub.f32 %v2931_v17, %v3323_v49 }
 0x846   :  { %5307 = vpow2.f32 %v3353_v50  ;;  %v3351_v52 = vmul.f32 1.442695, %v3341_v51  ;;  %v3332_v53 = vpop.xlane.xlu0 %3331 }
 0x847   :  { %v3344_v25 = vsub.f32 %v3159_v22, %v3332_v53 }
 0x848   :  { %5309 = vpow2.f32 %v3351_v52  ;;  %v3329_v26 = vpop.xlane.xlu1 %3328 }
 0x849   :  { %v3357_v54 = vmul.f32 1.442695, %v3344_v25  ;;  %v3343_v55 = vsub.f32 %v3083_v24, %v3329_v26 }
 0x84a   :  { %v3338_v56 = vpop.xlane.xlu0 %3337 }
 0x84b   :  { %5311 = vpow2.f32 %v3357_v54  ;;  %v3355_v57 = vmul.f32 1.442695, %v3343_v55  ;;  %v3346_v58 = vsub.f32 %v3311_v31, %v3338_v56  ;;  %v2703_v54 = vld [vmem:[%s6056_s6] sm:$0xff]  ;;  %v2704_v55 = vld [vmem:[%s6056_s6 + $0x8] sm:$0xff]  ;;  %v2706_v56 = vld [vmem:[%s6056_s6 + $0x18] sm:$0xff] }
 0x84c   :  { %v3335_v59 = vpop.xlane.xlu1 %3334 }
 0x84d   :  { %5313 = vpow2.f32 %v3355_v57  ;;  %v3361_v60 = vmul.f32 1.442695, %v3346_v58  ;;  %v3345_v61 = vsub.f32 %v3235_v35, %v3335_v59 }
 0x84e   :  { %v3480_v62 = vpop.permute.xlu0 %3479 }
 0x84f   :  { %v5304_v9 = vpop.eup %5303  ;;  %5315 = vpow2.f32 %v3361_v60  ;;  %v3359_v8 = vmul.f32 1.442695, %v3345_v61  ;;  %5176 = vmatpush3.msra.mxu1 %v3480_v62 }
 0x850   :  { %v3404_v63 = vpop.permute.xlu1 %3403  ;;  %v3366_v0 = vsel %vm372_vm2, %v5304_v9, 0.0  ;;  %5185 = vmatprep.subr.mxu1 %v5366_v18 }
 0x851   :  { %v5306_v1 = vpop.eup %5305  ;;  %5317 = vpow2.f32 %v3359_v8  ;;  %5171 = vmatpush3.msra.mxu0 %v3404_v63  ;;  %3367 = vadd.xlane.f32.xlu0 %v3366_v0 }
 0x852   :  { %v3363_v2 = vsel %vm372_vm2, %v5306_v1, 0.0  ;;  %5180 = vmatprep.subr.mxu0 %v5366_v18  ;;  %v3708_v23 = vpop.permute.xlu0 %3707 }
 0x853   :  { %v5308_v3 = vpop.eup %5307  ;;  %3364 = vadd.xlane.f32.xlu1 %v3363_v2 }
 0x854   :  { %v3372_v6 = vsel %vm372_vm2, %v5308_v3, 0.0  ;;  %v3556_v21 = vpop.permute.xlu1 %3555 }
 0x855   :  { %v5310_v7 = vpop.eup %5309  ;;  %3373 = vadd.xlane.f32.xlu0 %v3372_v6 }
 0x856   :  { %v3369_v10 = vsel %vm372_vm2, %v5310_v7, 0.0 }
 0x857   :  { %3370 = vadd.xlane.f32.xlu1 %v3369_v10 }
 0x858   :  { %v5312_v11 = vpop.eup %5311  ;;  %v3632_v22 = vpop.permute.xlu1 %3631 }
 0x859   :  { %v3378_v12 = vsel %vm372_vm2, %v5312_v11, 0.0 }
 0x85a   :  { %v5314_v13 = vpop.eup %5313  ;;  %3379 = vadd.xlane.f32.xlu0 %v3378_v12 }
 0x85b   :  { %v3375_v14 = vsel %vm372_vm2, %v5314_v13, 0.0 }
 0x85c   :  { %v5921_v15 = vpop.eup %5315  ;;  %3376 = vadd.xlane.f32.xlu1 %v3375_v14  ;;  %v3784_v24 = vpop.permute.xlu1 %3783  ;;  %v4343_v14 = vsub.s32 3, %v5678_v33 }
 0x85d   :  { %v3384_v17 = vsel %vm372_vm2, %v5921_v15, 0.0 }
 0x85e   :  { %v5925_v19 = vpop.eup %5317  ;;  %3385 = vadd.xlane.f32.xlu0 %v3384_v17 }
 0x85f   :  { %v3381_v20 = vsel %vm372_vm2, %v5925_v19, 0.0 }
 0x860   :  { %3382 = vadd.xlane.f32.xlu1 %v3381_v20 }
 0x871   :  { %3935 = vrot.lane.b32.xlu1 %v5871_v4, %s5368_s2 }
 0x874   :  { %3859 = vrot.lane.b32.xlu0 %v5880_v5, %s5368_s2 }
 0x8da   :  { %v3368_v27 = vpop.xlane.xlu0 %3367 }
 0x8db   :  { %5319 = vrcp.f32 %v3368_v27 }
 0x8dc   :  { %v3365_v29 = vpop.xlane.xlu1 %3364 }
 0x8dd   :  { %5321 = vrcp.f32 %v3365_v29 }
 0x8de   :  { %v3374_v31 = vpop.xlane.xlu0 %3373 }
 0x8df   :  { %5323 = vrcp.f32 %v3374_v31 }
 0x8e0   :  { %v3371_v32 = vpop.xlane.xlu1 %3370 }
 0x8e1   :  { %5325 = vrcp.f32 %v3371_v32 }
 0x8e3   :  { %v3380_v34 = vpop.xlane.xlu0 %3379 }
 0x8e4   :  { %5327 = vrcp.f32 %v3380_v34 }
 0x8e5   :  { %v3377_v35 = vpop.xlane.xlu1 %3376 }
 0x8e6   :  { %5329 = vrcp.f32 %v3377_v35 }
 0x8e7   :  { %v3386_v4 = vpop.xlane.xlu0 %3385 }
 0x8e8   :  { %v5320_v37 = vpop.eup %5319  ;;  %5331 = vrcp.f32 %v3386_v4 }
 0x8e9   :  { %v3383_v5 = vpop.xlane.xlu1 %3382  ;;  %v3396_v38 = vmul.f32 %v5320_v37, %v5304_v9 }
 0x8ea   :  { %v5322_v40 = vpop.eup %5321  ;;  %5333 = vrcp.f32 %v3383_v5 }
 0x8eb   :  { %5178 = vmatmul.mubr.msk.f32.vlgmr.msra.gmra.mxu1 %vm372_vm2, %v3396_v38  ;;  %v3395_v41 = vmul.f32 %v5322_v40, %v5306_v1  ;;  %v3860_v52 = vpop.permute.xlu0 %3859 }
 0x8ec   :  { %v5324_v42 = vpop.eup %5323  ;;  %5186 = vmatpush3.msra.mxu1 %v3632_v22  ;;  %5187 = vmatprep.mubr.msk.f32.mxu1 %vm5367_vm1, %v5366_v18 }
 0x8ed   :  { %5173 = vmatmul.mubr.msk.f32.vlgmr.msra.gmra.mxu0 %vm372_vm2, %v3395_v41  ;;  %5195 = vmatprep.subr.mxu1 %v5366_v18  ;;  %v3398_v43 = vmul.f32 %v5324_v42, %v5308_v3  ;;  %v3936_v49 = vpop.permute.xlu1 %3935 }
 0x8ee   :  { %v5326_v44 = vpop.eup %5325  ;;  %5181 = vmatpush3.msra.mxu0 %v3556_v21  ;;  %5182 = vmatprep.mubr.msk.f32.mxu0 %vm5367_vm1, %v5366_v18 }
 0x8ef   :  { %5188 = vmatmul.mubr.msk.f32.vlgmr.msra.gmra.mxu1 %vm372_vm2, %v3398_v43  ;;  %5190 = vmatprep.subr.mxu0 %v5366_v18  ;;  %v3397_v45 = vmul.f32 %v5326_v44, %v5310_v7 }
 0x8f0   :  { %5196 = vmatpush3.msra.mxu1 %v3784_v24  ;;  %5197 = vmatprep.mubr.msk.f32.mxu1 %vm5367_vm1, %v5366_v18 }
 0x8f1   :  { %v5328_v46 = vpop.eup %5327  ;;  %5183 = vmatmul.mubr.msk.f32.vlgmr.msra.gmra.mxu0 %vm372_vm2, %v3397_v45  ;;  %5205 = vmatprep.subr.mxu1 %v5366_v18 }
 0x8f2   :  { %5191 = vmatpush3.msra.mxu0 %v3708_v23  ;;  %v3400_v47 = vmul.f32 %v5328_v46, %v5312_v11  ;;  %5192 = vmatprep.mubr.msk.f32.mxu0 %vm5367_vm1, %v5366_v18  ;;  %v4344_v23 = vrot.slane %v5684_v39, %v4343_v14 }
 0x8f3   :  { %v5330_v48 = vpop.eup %5329  ;;  %5200 = vmatprep.subr.mxu0 %v5366_v18 }
 0x8f4   :  { %5198 = vmatmul.mubr.msk.f32.vlgmr.msra.gmra.mxu1 %vm372_vm2, %v3400_v47  ;;  %v3399_v50 = vmul.f32 %v5330_v48, %v5314_v13 }
 0x8f5   :  { %v5332_v51 = vpop.eup %5331  ;;  %5206 = vmatpush3.msra.mxu1 %v3936_v49  ;;  %5207 = vmatprep.mubr.msk.f32.mxu1 %vm5367_vm1, %v5366_v18  ;;  %v4389_v49 = vld [vmem:[%s6057_s7 + $0x10] sm:$0xff] }
 0x8f6   :  { %5193 = vmatmul.mubr.msk.f32.vlgmr.msra.gmra.mxu0 %vm372_vm2, %v3399_v50  ;;  %v3402_v53 = vmul.f32 %v5332_v51, %v5921_v15  ;;  %5215 = vmatprep.subr.mxu1 %v2704_v55  ;;  %v4388_v50 = vld [vmem:[%s6057_s7 + $0x8] sm:$0xff]  ;;  %v4387_v51 = vld [vmem:[%s6057_s7] sm:$0xff] }
 0x8f7   :  { %v5334_v25 = vpop.eup %5333  ;;  %5201 = vmatpush3.msra.mxu0 %v3860_v52  ;;  %5202 = vmatprep.mubr.msk.f32.mxu0 %vm5367_vm1, %v5366_v18  ;;  %v2705_v18 = vld [vmem:[%s6056_s6 + $0x10] sm:$0xff]  ;;  %v4485_v52 = vld [vmem:[%s6058_s8 + $0x38] sm:$0xff]  ;;  %s4619_s6 = sshll.u32 %s5370_s21, 4  ;;  %s4620_s6 = int_to_ptr.vmem [resolvable:$true] %s4619_s6 }
 0x8f8   :  { %5208 = vmatmul.mubr.msk.f32.vlgmr.msra.gmra.mxu1 %vm372_vm2, %v3402_v53  ;;  %v3401_v26 = vmul.f32 %v5334_v25, %v5925_v19  ;;  %5210 = vmatprep.subr.mxu0 %v2703_v54  ;;  %v4484_v53 = vld [vmem:[%s6058_s8 + $0x30] sm:$0xff]  ;;  %v4483_v25 = vld [vmem:[%s6058_s8 + $0x28] sm:$0xff]  ;;  %p5349_p1 = scmp.lt.s32.totalorder %s4620_s6, %s4620_s6 }
 0x8f9   :  { %5216 = vmatpush3.msra.mxu1 %v2704_v55 }
 0x8fa   :  { %5203 = vmatmul.mubr.msk.f32.vlgmr.msra.gmra.mxu0 %vm372_vm2, %v3401_v26  ;;  %5225 = vmatprep.subr.mxu1 %v2706_v56  ;;  %v4482_v26 = vld [vmem:[%s6058_s8 + $0x20] sm:$0xff] }
 0x8fb   :  { %5211 = vmatpush3.msra.mxu0 %v2703_v54 }
 0x8fc   :  { %5220 = vmatprep.subr.mxu0 %v2705_v18 }
 0x9ab   :  { %v3551_v57 = vpop.f32.mrf.mxu1 }
 0x9ad   :  { %v3475_v58 = vpop.f32.mrf.mxu0  ;;  %v5179_v59 = vpop.f32.mrf.mxu1 }
 0x9ae   :  { %5212 = vmatprep.mubr.msk.f32.mxu0 %vm372_vm2, %v3475_v58  ;;  %v4377_v59 = vsub.s32 4, %v5678_v33 }
 0x9af   :  { %v5174_v60 = vpop.f32.mrf.mxu0  ;;  %v3703_v61 = vpop.f32.mrf.mxu1  ;;  %5213 = vmatmul.mubr.msk.f32.vlgmr.msra.gmra.mxu0 %vm372_vm2, %v3551_v57 }
 0x9b0   :  { %5221 = vmatpush3.msra.mxu0 %v2705_v18  ;;  %v4383_v60 = vsub.s32 5, %v5678_v33 }
 0x9b1   :  { %v3627_v62 = vpop.f32.mrf.mxu0  ;;  %v5189_v9 = vpop.f32.mrf.mxu1 }
 0x9b2   :  { %5217 = vmatprep.mubr.msk.f32.mxu1 %vm372_vm2, %v3627_v62 }
 0x9b3   :  { %v5184_v8 = vpop.f32.mrf.mxu0  ;;  %5218 = vmatmul.mubr.msk.f32.vlgmr.msra.gmra.mxu1 %vm372_vm2, %v3703_v61  ;;  %v4378_v61 = vrot.slane %v5684_v39, %v4377_v59 }
 0x9b4   :  { %v3855_v63 = vpop.f32.mrf.mxu1  ;;  %5226 = vmatpush3.msra.mxu1 %v2706_v56  ;;  %v4384_v8 = vrot.slane %v5684_v39, %v4383_v60  ;;  %v4480_v39 = vld [vmem:[%s6058_s8 + $0x10] sm:$0xff] }
 0x9b5   :  { %5241 = vmatprep.subr.mxu1 %v4485_v52 }
 0x9b6   :  { %v3779_v0 = vpop.f32.mrf.mxu0  ;;  %v5199_v1 = vpop.f32.mrf.mxu1 }
 0x9b7   :  { %5222 = vmatprep.mubr.msk.f32.mxu0 %vm372_vm2, %v3779_v0 }
 0x9b8   :  { %v5194_v2 = vpop.f32.mrf.mxu0  ;;  %v4007_v3 = vpop.f32.mrf.mxu1  ;;  %5223 = vmatmul.mubr.msk.f32.vlgmr.msra.gmra.mxu0 %vm372_vm2, %v3855_v63 }
 0x9ba   :  { %v3931_v6 = vpop.f32.mrf.mxu0  ;;  %v5209_v7 = vpop.f32.mrf.mxu1 }
 0x9bb   :  { %5227 = vmatprep.mubr.msk.f32.mxu1 %vm372_vm2, %v3931_v6  ;;  %v4481_v7 = vld [vmem:[%s6058_s8 + $0x18] sm:$0xff] }
 0x9bc   :  { %v5204_v10 = vpop.f32.mrf.mxu0  ;;  %5228 = vmatmul.mubr.msk.f32.vlgmr.msra.gmra.mxu1 %vm372_vm2, %v4007_v3 }
 0x9bd   :  { %5242 = vmatpush3.msra.mxu1 %v4485_v52  ;;  %v4479_v10 = vld [vmem:[%s6058_s8 + $0x8] sm:$0xff] }
 0x9be   :  { %5243 = vmatprep.subr.mxu1 %v4484_v53  ;;  %v41_v52 = vld [vmem:[%s6059_s9 + $0x8] sm:$0x3] }
 0x9bf   :  { %5244 = vmatpush3.msra.mxu1 %v4484_v53  ;;  %v4603_v53 = vrot.slane %v41_v52, %v2014_v36 }
 0x9c0   :  { %5245 = vmatprep.subr.mxu1 %v4483_v25 }
 0x9c1   :  { %5246 = vmatpush3.msra.mxu1 %v4483_v25 }
 0x9c2   :  { %5247 = vmatprep.subr.mxu1 %v4482_v26 }
 0x9c3   :  { %5248 = vmatpush3.msra.mxu1 %v4482_v26  ;;  %v4609_v26 = vrot.slane %v41_v52, %v2049_v16 }
 0x9c4   :  { %5249 = vmatprep.subr.mxu1 %v4481_v7 }
 0x9c5   :  { %5250 = vmatpush3.msra.mxu1 %v4481_v7 }
 0x9c6   :  { %5251 = vmatprep.subr.mxu1 %v4480_v39 }
 0x9c7   :  { %5252 = vmatpush3.msra.mxu1 %v4480_v39 }
 0x9c8   :  { %5253 = vmatprep.subr.mxu1 %v4479_v10 }
 0x9c9   :  { %5254 = vmatpush3.msra.mxu1 %v4479_v10 }
 0xa6f   :  { %v5214_v11 = vpop.f32.mrf.mxu0 }
 0xa71   :  { %v4083_v13 = vpop.f32.mrf.mxu0 }
 0xa73   :  { %v5219_v12 = vpop.f32.mrf.mxu1 }
 0xa74   :  { %v4336_v19 = vadd.f32 %v5219_v12, %v5214_v11  ;;  %v4478_v11 = vld [vmem:[%s6058_s8] sm:$0xff]  ;;  %v4393_v12 = vsub.s32 6, %v5678_v33 }
 0xa75   :  { %v4164_v15 = vpop.f32.mrf.mxu1  ;;  %5255 = vmatprep.subr.mxu1 %v4478_v11 }
 0xa76   :  { %v4335_v21 = vadd.f32 %v4164_v15, %v4083_v13  ;;  %5256 = vmatpush3.msra.mxu1 %v4478_v11  ;;  %v5343_v13 = vld [vmem:[%s6059_s9] sm:$0xff]  ;;  %s5344_s9 = scalar_lea.vmem %s4620_s6, 256 }
 0xa77   :  { %v4394_v14 = vrot.slane %v5343_v13, %v4393_v12  ;;  %p5345_p0 = scmp.ne.s32.totalorder %s4620_s6, %s5344_s9  ;;  %p5350_p2 = scmp.lt.s32.totalorder %s5344_s9, %s5344_s9 }
 0xa78   :  { %v5224_v17 = vpop.f32.mrf.mxu0 }
 0xa79   :  { %v4338_v22 = vadd.f32 %v5224_v17, %v4336_v19  ;;  %p5351_p3 = por %p5350_p2, %p5349_p1 }
 0xa7a   :  { %v4245_v20 = vpop.f32.mrf.mxu0 }
 0xa7b   :  { %v4337_v27 = vadd.f32 %v4335_v21, %v4245_v20  ;;  %p5352_p4 = pnand %p5351_p3, %p5345_p0 }
 0xa7c   :  { %v5229_v24 = vpop.f32.mrf.mxu1 }
 0xa7d   :  { %v4340_v29 = vadd.f32 %v5229_v24, %v4338_v22 }
 0xa7e   :  { %v4326_v31 = vpop.f32.mrf.mxu1 }
 0xa7f   :  { %v4346_v32 = vadd.f32 %v4344_v23, %v4340_v29  ;;  %v4339_v34 = vadd.f32 %v4337_v27, %v4326_v31 }
 0xa81   :  { %v4345_v35 = vadd.f32 %v4344_v23, %v4339_v34  ;;  %v4348_v4 = vadd.f32 %v4346_v32, %v5737_v30  ;;  %v4488_v23 = vsub.s32 7, %v5678_v33 }
 0xa83   :  { %v4352_v37 = vsel %vm58_vm0, %v4348_v4, 0.0  ;;  %v4347_v5 = vadd.f32 %v4345_v35, %v5731_v28  ;;  %v4390_v28 = vld [vmem:[%s6057_s7 + $0x18] sm:$0xff]  ;;  %v4489_v24 = vrot.slane %v5343_v13, %v4488_v23 }
 0xa84   :  { %4353 = vadd.xlane.f32.xlu1 %v4352_v37  ;;  %5230 = vmatprep.subr.mxu0 %v4390_v28 }
 0xa85   :  { %v4349_v38 = vsel %vm58_vm0, %v4347_v5, 0.0  ;;  %5231 = vmatpush3.msra.mxu0 %v4390_v28 }
 0xa86   :  { %4350 = vadd.xlane.f32.xlu0 %v4349_v38  ;;  %5232 = vmatprep.subr.mxu0 %v4389_v49 }
 0xa87   :  { %5233 = vmatpush3.msra.mxu0 %v4389_v49 }
 0xa88   :  { %5234 = vmatprep.subr.mxu0 %v4388_v50 }
 0xa89   :  { %5235 = vmatpush3.msra.mxu0 %v4388_v50 }
 0xa8a   :  { %5236 = vmatprep.subr.mxu0 %v4387_v51 }
 0xa8b   :  { %5237 = vmatpush3.msra.mxu0 %v4387_v51 }
 0xb0d   :  { %v4354_v40 = vpop.xlane.xlu1 %4353 }
 0xb0e   :  { %v4356_v41 = vmul.f32 0.03125, %v4354_v40 }
 0xb0f   :  { %v4351_v42 = vpop.xlane.xlu0 %4350 }
 0xb10   :  { %v4355_v43 = vmul.f32 0.03125, %v4351_v42  ;;  %v4358_v44 = vsub.f32 %v4348_v4, %v4356_v41 }
 0xb12   :  { %v4357_v45 = vsub.f32 %v4347_v5, %v4355_v43  ;;  %v4360_v48 = vmul.f32 %v4358_v44, %v4358_v44 }
 0xb14   :  { %v4359_v46 = vmul.f32 %v4357_v45, %v4357_v45  ;;  %v4364_v30 = vsel %vm58_vm0, %v4360_v48, 0.0 }
 0xb16   :  { %v4361_v47 = vsel %vm58_vm0, %v4359_v46, 0.0 }
 0xb17   :  { %4362 = vadd.xlane.f32.xlu0 %v4361_v47 }
 0xb1b   :  { %4365 = vadd.xlane.f32.xlu0 %v4364_v30 }
 0xba0   :  { %v4363_v54 = vpop.xlane.xlu0 %4362 }
 0xba1   :  { %v4367_v55 = vmul.f32 0.03125, %v4363_v54 }
 0xba3   :  { %v4369_v18 = vadd.f32 1e-05, %v4367_v55 }
 0xba4   :  { %v4366_v56 = vpop.xlane.xlu0 %4365 }
 0xba5   :  { %5335 = vrsqrt.f32 %v4369_v18  ;;  %v4368_v57 = vmul.f32 0.03125, %v4366_v56 }
 0xba7   :  { %v4370_v58 = vadd.f32 1e-05, %v4368_v57 }
 0xba9   :  { %5337 = vrsqrt.f32 %v4370_v58 }
 0xbb2   :  { %v5336_v62 = vpop.eup %5335 }
 0xbb3   :  { %v4373_v9 = vmul.f32 %v5336_v62, %v4357_v45 }
 0xbb5   :  { %v4379_v63 = vmul.f32 %v4378_v61, %v4373_v9 }
 0xbb6   :  { %v5338_v0 = vpop.eup %5337 }
 0xbb7   :  { %v4374_v1 = vmul.f32 %v5338_v0, %v4358_v44  ;;  %v4385_v2 = vadd.f32 %v4384_v8, %v4379_v63 }
 0xbb9   :  { %v4380_v3 = vmul.f32 %v4378_v61, %v4374_v1  ;;  %5238 = vmatprep.mubr.msk.f32.mxu0 %vm58_vm0, %v4385_v2 }
 0xbbb   :  { %v4386_v6 = vadd.f32 %v4384_v8, %v4380_v3 }
 0xbbd   :  { %5239 = vmatmul.mubr.msk.f32.vlgmr.msra.gmra.mxu0 %vm58_vm0, %v4386_v6 }
 0xc7d   :  { %v5240_v15 = vpop.f32.mrf.mxu0 }
 0xc7e   :  { %v4473_v17 = vadd.f32 %v5240_v15, %v4394_v14 }
 0xc7f   :  { %v4467_v19 = vpop.f32.mrf.mxu0 }
 0xc80   :  { %v4468_v20 = vadd.f32 %v4467_v19, %v4394_v14  ;;  %v4477_v22 = vmax.f32 %v4473_v17, 0.0 }
 0xc82   :  { %v4476_v21 = vmax.f32 %v4468_v20, 0.0 }
 0xc84   :  { %5257 = vmatprep.mubr.msk.f32.mxu1 %vm4490_vm3, %v4476_v21 }
 0xc85   :  { %5258 = vmatmul.mubr.msk.f32.vlgmr.msra.gmra.mxu1 %vm4490_vm3, %v4477_v22 }
 0xd45   :  { %v5259_v27 = vpop.f32.mrf.mxu1 }
 0xd46   :  { %v4569_v29 = vadd.f32 %v5259_v27, %v4489_v24 }
 0xd47   :  { %v4563_v31 = vpop.f32.mrf.mxu1 }
 0xd48   :  { %v4564_v32 = vadd.f32 %v4563_v31, %v4489_v24  ;;  %v4573_v34 = vadd.f32 %v4569_v29, %v4386_v6 }
 0xd4a   :  { %v4577_v35 = vsel %vm58_vm0, %v4573_v34, 0.0  ;;  %v4572_v4 = vadd.f32 %v4564_v32, %v4385_v2 }
 0xd4b   :  { %4578 = vadd.xlane.f32.xlu0 %v4577_v35 }
 0xd4c   :  { %v4574_v37 = vsel %vm58_vm0, %v4572_v4, 0.0 }
 0xd4d   :  { %4575 = vadd.xlane.f32.xlu1 %v4574_v37 }
 0xdd4   :  { %v4579_v5 = vpop.xlane.xlu0 %4578 }
 0xdd5   :  { %v4581_v38 = vmul.f32 0.03125, %v4579_v5 }
 0xdd6   :  { %v4576_v40 = vpop.xlane.xlu1 %4575 }
 0xdd7   :  { %v4583_v41 = vsub.f32 %v4573_v34, %v4581_v38  ;;  %v4580_v42 = vmul.f32 0.03125, %v4576_v40 }
 0xdd9   :  { %v4582_v43 = vsub.f32 %v4572_v4, %v4580_v42  ;;  %v4585_v44 = vmul.f32 %v4583_v41, %v4583_v41 }
 0xddb   :  { %v4589_v45 = vsel %vm58_vm0, %v4585_v44, 0.0  ;;  %v4584_v46 = vmul.f32 %v4582_v43, %v4582_v43 }
 0xddc   :  { %4590 = vadd.xlane.f32.xlu0 %v4589_v45 }
 0xddd   :  { %v4586_v47 = vsel %vm58_vm0, %v4584_v46, 0.0 }
 0xdde   :  { %4587 = vadd.xlane.f32.xlu1 %v4586_v47 }
 0xe65   :  { %v4591_v48 = vpop.xlane.xlu0 %4590 }
 0xe66   :  { %v4593_v30 = vmul.f32 0.03125, %v4591_v48 }
 0xe67   :  { %v4588_v28 = vpop.xlane.xlu1 %4587 }
 0xe68   :  { %v4595_v49 = vadd.f32 1e-05, %v4593_v30  ;;  %v4592_v50 = vmul.f32 0.03125, %v4588_v28 }
 0xe6a   :  { %5339 = vrsqrt.f32 %v4595_v49  ;;  %v4594_v51 = vadd.f32 1e-05, %v4592_v50 }
 0xe6c   :  { %5341 = vrsqrt.f32 %v4594_v51 }
 0xe77   :  { %v5340_v25 = vpop.eup %5339 }
 0xe78   :  { %v4599_v54 = vmul.f32 %v5340_v25, %v4583_v41 }
 0xe79   :  { %v5342_v55 = vpop.eup %5341 }
 0xe7a   :  { %v4598_v18 = vmul.f32 %v5342_v55, %v4582_v43  ;;  %v4605_v56 = vmul.f32 %v4603_v53, %v4599_v54 }
 0xe7c   :  { %v4604_v57 = vmul.f32 %v4603_v53, %v4598_v18  ;;  %v4611_v58 = vadd.f32 %v4609_v26, %v4605_v56 }
 0xe7e   :  { %v4610_v59 = vadd.f32 %v4609_v26, %v4604_v57  ;;  %4613 = vst.msk [vmem:[#allocation2 + $0x8] sm:$0xff] %vm58_vm0, %v4611_v58 }
 0xe80   :  { %4612 = vst.msk [vmem:[#allocation2] sm:$0xff] %vm58_vm0, %v4610_v59 }
 0xe81   :  { %5355 = shalt.err (!%p5352_p4)
}
 0xe82   :  { %s5371_s22 = smov 128   ;;  %s5372_s23 = smov 8  }
 0xe83   :  { %4625 = dma.vmem_to_hbm [thread:$0]  %s4620_s6, 256, %s6060_s10, [#allocation3], %s5371_s22, %s5371_s22, %s5372_s23  }
 0xe84   :  { %5364 = dma.done.wait [#allocation3], 256  }
 0xe85   :  { %5365 = vsyncadd [#allocation3], 4294967040 }
 0xe86   :  { %4629 = vsyncpa [#allocation3], 1 }

</bundles_post_ra>
